<compile_context>
chip_gen: v5e
topology: v5e:2x2
jax: 0.10.0
libtpu: 0.0.40
codegen_flags: <defaults>
</compile_context>

<pallas_src>
import math
import numpy as np
import jax
import jax.numpy as jnp
from jax.experimental import pallas as pl
from jax.experimental.pallas import tpu as pltpu


def _roi_align_kernel(bix_ref, h0_ref, a_ref, b_ref, feat_ref, out_ref, acc_ref):
    # bix_ref, h0_ref : scalar-prefetch (consumed by the index_maps only)
    # a_ref   : (1, 1, P, th)    y-weights A[p, y] for this box's H-chunk
    # b_ref   : (1, P, W)        x-weights B[q, x] for this box
    # feat_ref: (1, 1, th*W, C)  feature rows of this chunk, (y, x) flattened
    # out_ref : (1, P*P, C)      lane-dense pooled output for this box
    # acc_ref : (P*P, C) f32     accumulator across H chunks
    del bix_ref, h0_ref
    h = pl.program_id(1)

    @pl.when(h == 0)
    def _():
        acc_ref[...] = jnp.zeros_like(acc_ref)

    a_py = a_ref[0, 0]            # (P, th)   f32
    b_qx = b_ref[0]               # (P, W)    f32
    feat = feat_ref[0, 0]         # (th*W, C) feature dtype (f32 or bf16)
    P, th = a_py.shape
    W = b_qx.shape[1]

    # kron weight k[(p, q), (y, x)] = A[p, y] * B[q, x]; single fused MXU
    # contraction over (y, x): (P*P, th*W) @ (th*W, C) -> (P*P, C).
    k = (a_py[:, None, :, None] * b_qx[None, :, None, :]).reshape(P * P, th * W)
    acc_ref[...] += jnp.dot(k.astype(feat.dtype), feat,
                            preferred_element_type=jnp.float32)

    @pl.when(h == pl.num_programs(1) - 1)
    def _():
        out_ref[0] = acc_ref[...].astype(out_ref.dtype)


class RelationROIPoolerPallas:
    def __init__(self, output_size, scales, sampling_ratio,
                 canonical_box_size=224, canonical_level=4, h_block=32):
        if isinstance(output_size, int):
            output_size = (output_size, output_size)
        assert len(output_size) == 2 and output_size[0] == output_size[1]
        self.output_size = tuple(int(v) for v in output_size)
        self.scales = tuple(float(s) for s in scales)
        self.sampling_ratio = int(sampling_ratio)
        # TODO(synk): only fixed sampling_ratio > 0 (the usual config) is supported.
        assert self.sampling_ratio > 0
        min_level = -math.log2(scales[0])
        max_level = -math.log2(scales[-1])
        assert math.isclose(min_level, int(min_level))
        assert math.isclose(max_level, int(max_level))
        self.min_level = int(min_level)
        self.max_level = int(max_level)
        assert len(scales) == self.max_level - self.min_level + 1
        self.canonical_level = canonical_level
        self.canonical_box_size = canonical_box_size
        self.h_block = int(h_block)

    # ---- tile planning -------------------------------------------------------
    def _plan_h_block(self, H, W, C, feat_itemsize):
        P = self.output_size[0]
        th = max(1, min(self.h_block, H))

        def footprint(t):
            feat_blk = t * W * C * feat_itemsize          # one feature buffer
            kron = P * P * t * W * 4                      # kron value (+relayout temp)
            return 2 * feat_blk + 2 * kron + 4 * P * P * C * 4

        # shrink the H chunk until the double-buffered footprint is modest;
        # the 16 MiB target leaves 3x headroom under the 48 MiB scoped limit,
        # which itself fits v7x's 64 MiB/TC physical VMEM.
        while th > 8 and footprint(th) > 16 * 1024 * 1024:
            th = (th + 1) // 2
        if 8 <= th < H:
            th -= th % 8                                   # DMA-friendly, not required
        return th, int(footprint(th))

    # ---- separable bilinear interpolation weights (per level) ----------------
    def _interp_weights(self, c0, c1, scale, size, size_max):
        P = self.output_size[0]
        sr = self.sampling_ratio
        start = c0 * scale - 0.5                     # aligned=True
        end = c1 * scale - 0.5
        bin_size = (end - start) / P                 # (M,)
        p = jnp.arange(P, dtype=jnp.float32)[None, :, None]
        s = jnp.arange(sr, dtype=jnp.float32)[None, None, :]
        coord = (start[:, None, None] + p * bin_size[:, None, None]
                 + (s + 0.5) * bin_size[:, None, None] / sr)      # (M, P, sr)
        valid = ((coord >= -1.0) & (coord <= float(size))).astype(jnp.float32)
        cc = jnp.clip(coord, 0.0, float(size) - 1.0)
        grid = jnp.arange(size_max, dtype=jnp.float32)
        w = jnp.maximum(0.0, 1.0 - jnp.abs(cc[..., None] - grid)) * valid[..., None]
        # NOTE: cc <= size-1, so weights at padded rows (>= size) are exactly
        # zero; zero-padded feature rows never contribute (load-bearing).
        return w.sum(axis=2) / sr                    # (M, P, size_max)

    # ---- pool all boxes assigned to one FPN level -----------------------------
    def _pool_level(self, feat_nchw, boxes_np, bix_np, scale):
        N, C, H, W = (int(v) for v in feat_nchw.shape)
        P = self.output_size[0]
        PP = P * P
        M_l = int(boxes_np.shape[0])
        feat_itemsize = jnp.dtype(feat_nchw.dtype).itemsize

        th, fp = self._plan_h_block(H, W, C, feat_itemsize)
        n_h_total = -(-H // th)
        Hp = n_h_total * th

        # ---- host-side ROI H-window (boxes are concrete) ---------------------
        y_lo = np.minimum(boxes_np[:, 1], boxes_np[:, 3]) * scale - 0.5
        y_hi = np.maximum(boxes_np[:, 1], boxes_np[:, 3]) * scale - 0.5
        row_lo = np.clip(np.floor(y_lo), 0, H - 1).astype(np.int64)
        row_hi = np.clip(np.floor(y_hi) + 1.0, 0, H - 1).astype(np.int64)
        blk_lo = row_lo // th
        blk_hi = row_hi // th
        n_h_grid = int(min(n_h_total, max(1, int((blk_hi - blk_lo + 1).max()))))
        h0_np = np.clip(blk_lo, 0, n_h_total - n_h_grid).astype(np.int32)
        # rows outside a box's window have zero weight, so clamping h0 (and the
        # shared n_h_grid extent) only adds zero-contribution chunks.

        # sort by (image, first H-block): when n_h_grid == 1 consecutive grid
        # steps then revisit the same feature block and Pallas skips the DMA.
        perm = np.lexsort((h0_np, bix_np))
        boxes_s = boxes_np[perm]
        bix_s = bix_np[perm].astype(np.int32)
        h0_s = h0_np[perm]

        # ---- feature layout: NHWC, H padded, (th, W) rows flattened ----------
        feat = jnp.transpose(feat_nchw, (0, 2, 3, 1))          # (N, H, W, C)
        if Hp > H:
            feat = jnp.pad(feat, ((0, 0), (0, Hp - H), (0, 0), (0, 0)))
        feat = feat.reshape(N, n_h_total, th * W, C)           # free, row-major

        # ---- separable bilinear weights (kept f32; cast to feat dtype in-kernel)
        boxes_j = jnp.asarray(boxes_s, jnp.float32)
        a = self._interp_weights(boxes_j[:, 1], boxes_j[:, 3], scale, H, Hp)  # (M,P,Hp)
        b = self._interp_weights(boxes_j[:, 0], boxes_j[:, 2], scale, W, W)   # (M,P,W)
        a = a.reshape(M_l, P, n_h_total, th).transpose(0, 2, 1, 3)            # (M,n_h,P,th)

        out = pl.pallas_call(
            _roi_align_kernel,
            out_shape=jax.ShapeDtypeStruct((M_l, PP, C), feat_nchw.dtype),
            grid_spec=pltpu.PrefetchScalarGridSpec(
                num_scalar_prefetch=2,
                grid=(M_l, n_h_grid),
                in_specs=[
                    pl.BlockSpec((1, 1, P, th),
                                 lambda i, h, bx, h0: (i, h0[i] + h, 0, 0)),
                    pl.BlockSpec((1, P, W),
                                 lambda i, h, bx, h0: (i, 0, 0)),
                    pl.BlockSpec((1, 1, th * W, C),
                                 lambda i, h, bx, h0: (bx[i], h0[i] + h, 0, 0)),
                ],
                out_specs=pl.BlockSpec((1, PP, C),
                                       lambda i, h, bx, h0: (i, 0, 0)),
                scratch_shapes=[pltpu.VMEM((PP, C), jnp.float32)],
            ),
            compiler_params=pltpu.CompilerParams(
                dimension_semantics=("parallel", "arbitrary"),
                # footprint-derived; capped at 48 MiB (fits v7x 64 MiB/TC).
                vmem_limit_bytes=int(min(48 << 20, max(16 << 20, 2 * fp)))),
        )(jnp.asarray(bix_s), jnp.asarray(h0_s), a, b, feat)

        # undo the (image, window) sort, then (M, P*P, C) -> (M, C, P, P)
        out = out[np.argsort(perm)]
        return jnp.transpose(out.reshape(M_l, P, P, C), (0, 3, 1, 2))

    def __call__(self, x, box_lists):
        num_levels = len(self.scales)
        assert isinstance(x, list) and len(x) == num_levels
        N, C = int(x[0].shape[0]), int(x[0].shape[1])
        P = self.output_size[0]
        assert len(box_lists) == N
        if len(box_lists) == 0:
            return jnp.zeros((0, C, P, P), x[0].dtype)

        boxes_per_img = [np.asarray(b, np.float64).reshape(-1, 4) for b in box_lists]
        bix_np = np.concatenate([np.full((b.shape[0],), i, np.int32)
                                 for i, b in enumerate(boxes_per_img)], axis=0)
        boxes_np = np.concatenate(boxes_per_img, axis=0)
        M = int(boxes_np.shape[0])
        if M == 0:
            return jnp.zeros((0, C, P, P), x[0].dtype)

        # assign_boxes_to_levels (host side, boxes are concrete)
        areas = (boxes_np[:, 2] - boxes_np[:, 0]) * (boxes_np[:, 3] - boxes_np[:, 1])
        sizes = np.sqrt(np.maximum(areas, 0.0))
        lvl = np.floor(self.canonical_level +
                       np.log2(sizes / self.canonical_box_size + 1e-8))
        lvl = np.clip(lvl, self.min_level, self.max_level).astype(np.int64) - self.min_level

        out = jnp.zeros((M, C, P, P), x[0].dtype)
        for level in range(num_levels):
            idx = np.nonzero(lvl == level)[0]
            if idx.size == 0:
                continue
            pooled = self._pool_level(x[level], boxes_np[idx], bix_np[idx],
                                      self.scales[level])
            out = out.at[idx].set(pooled.astype(out.dtype))
        return out


# ---------------- numpy reference (direct per-sample bilinear ROIAlign) ------
def _bilinear_np(feat, y, x):
    C, H, W = feat.shape
    if y < -1.0 or y > H or x < -1.0 or x > W:
        return np.zeros(C, np.float32)
    y = min(max(y, 0.0), H - 1.0)
    x = min(max(x, 0.0), W - 1.0)
    y0, x0 = int(np.floor(y)), int(np.floor(x))
    y1 = y0 if y0 >= H - 1 else y0 + 1
    x1 = x0 if x0 >= W - 1 else x0 + 1
    ly, lx = y - y0, x - x0
    hy, hx = 1.0 - ly, 1.0 - lx
    return (hy * hx * feat[:, y0, x0] + hy * lx * feat[:, y0, x1]
            + ly * hx * feat[:, y1, x0] + ly * lx * feat[:, y1, x1])


def _roi_align_ref_np(feat, box, scale, P, sr):
    C = feat.shape[0]
    x0, y0, x1, y1 = [float(v) for v in box]
    sx0, sy0 = x0 * scale - 0.5, y0 * scale - 0.5
    sx1, sy1 = x1 * scale - 0.5, y1 * scale - 0.5
    bw, bh = (sx1 - sx0) / P, (sy1 - sy0) / P
    out = np.zeros((C, P, P), np.float32)
    for ph in range(P):
        for pw in range(P):
            acc = np.zeros(C, np.float32)
            for iy in range(sr):
                yy = sy0 + ph * bh + (iy + 0.5) * bh / sr
                for ix in range(sr):
                    xx = sx0 + pw * bw + (ix + 0.5) * bw / sr
                    acc += _bilinear_np(feat, yy, xx)
            out[:, ph, pw] = acc / (sr * sr)
    return out


if __name__ == "__main__":
    # small config: image 64x64, two pyramid levels (strides 4 and 8)
    N, C, P = 2, 8, 8
    scales = (1.0 / 4.0, 1.0 / 8.0)
    sampling_ratio = 2
    canonical_box_size, canonical_level = 32, 3

    key = jax.random.PRNGKey(0)
    k1, k2, k3, k4 = jax.random.split(key, 4)
    feats = [jax.random.normal(k1, (N, C, 16, 16), jnp.float32),
             jax.random.normal(k2, (N, C, 8, 8), jnp.float32)]
    xy0 = jax.random.uniform(k3, (N, 3, 2), minval=0.0, maxval=16.0)
    wh = jax.random.uniform(k4, (N, 3, 2), minval=4.0, maxval=46.0)
    boxes = jnp.concatenate([xy0, xy0 + wh], axis=-1)        # (N, 3, 4) XYXY
    box_lists = [boxes[i] for i in range(N)]

    # h_block=8 -> level 0 (H=16) exercises the windowed multi-chunk path,
    # level 1 (H=8) the single-chunk path.
    pooler = RelationROIPoolerPallas(P, scales, sampling_ratio,
                                     canonical_box_size=canonical_box_size,
                                     canonical_level=canonical_level,
                                     h_block=8)

    # reference (pure numpy, same semantics as torchvision roi_align aligned=True)
    boxes_np = np.asarray(boxes, np.float64).reshape(-1, 4)
    bix_np = np.repeat(np.arange(N), 3)

    def reference(feats_np_list):
        ref = np.zeros((boxes_np.shape[0], C, P, P), np.float32)
        for m, b in enumerate(boxes_np):
            size = math.sqrt(float(max((b[2] - b[0]) * (b[3] - b[1]), 0.0)))
            lvl = int(math.floor(canonical_level +
                                 math.log2(size / canonical_box_size + 1e-8)))
            lvl = min(max(lvl, 2), 3) - 2
            ref[m] = _roi_align_ref_np(feats_np_list[lvl][bix_np[m]], b,
                                       scales[lvl], P, sampling_ratio)
        return ref

    # 1) f32 features: strict check
    out_f32 = jax.block_until_ready(pooler(feats, box_lists))
    np.testing.assert_allclose(np.asarray(out_f32),
                               reference([np.asarray(f, np.float32) for f in feats]),
                               rtol=1e-4, atol=2e-4)

    # 2) bf16 features: bf16 MXU operands + halved feature DMA, loose tolerance
    feats_bf16 = [f.astype(jnp.bfloat16) for f in feats]
    out_bf16 = jax.block_until_ready(pooler(feats_bf16, box_lists))
    ref_bf16 = reference([np.asarray(f, np.float32) for f in feats_bf16])
    np.testing.assert_allclose(np.asarray(out_bf16).astype(np.float32), ref_bf16,
                               rtol=5e-2, atol=5e-2)

    print("KERNEL_OK")
</pallas_src>

<mosaic_0001>
module attributes {stable_mosaic.version = 11 : i64} {
  func.func @_roi_align_kernel(%arg0: i32, %arg1: i32, %arg2: memref<5xi32, #tpu.memory_space<smem>>, %arg3: memref<5xi32, #tpu.memory_space<smem>>, %arg4: memref<1x1x8x8xf32, #tpu.memory_space<vmem>>, %arg5: memref<1x8x16xf32, #tpu.memory_space<vmem>>, %arg6: memref<1x1x128x8xf32, #tpu.memory_space<vmem>>, %arg7: memref<1x64x8xf32, #tpu.memory_space<vmem>>, %arg8: memref<64x8xf32, #tpu.memory_space<vmem>>) attributes {dimension_semantics = [#tpu.dimension_semantics<parallel>, #tpu.dimension_semantics<arbitrary>], iteration_bounds = array<i64: 5, 2>, scalar_prefetch = 2 : i64, scratch_operands = 1 : i64, tpu.core_type = #tpu.core_type<tc>, window_params = [{transform_indices = @transform_0, window_bounds = array<i64: 1, 1, 8, 8>}, {transform_indices = @transform_1, window_bounds = array<i64: 1, 8, 16>}, {transform_indices = @transform_2, window_bounds = array<i64: 1, 1, 128, 8>}, {transform_indices = @transform_3, window_bounds = array<i64: 1, 64, 8>}]} {
    %c0_i32 = arith.constant 0 : i32
    %0 = arith.cmpi eq, %arg1, %c0_i32 : i32
    %1 = arith.extui %0 : i1 to i32
    %c0_i32_0 = arith.constant 0 : i32
    %2 = arith.cmpi ne, %1, %c0_i32_0 : i32
    scf.if %2 {
      %cst_16 = arith.constant 0.000000e+00 : f32
      %22 = vector.broadcast %cst_16 : f32 to vector<64x8xf32>
      %c0_17 = arith.constant 0 : index
      %c0_18 = arith.constant 0 : index
      %23 = vector.load %arg8[%c0_17, %c0_18] : memref<64x8xf32, #tpu.memory_space<vmem>>, vector<64x8xf32>
      tpu.vector_store %arg8[%c0_17, %c0_18], %22 {strides = array<i32>} : memref<64x8xf32, #tpu.memory_space<vmem>>, vector<64x8xf32>,
    } else {
    }
    %c0 = arith.constant 0 : index
    %c0_1 = arith.constant 0 : index
    %c0_2 = arith.constant 0 : index
    %c0_3 = arith.constant 0 : index
    %3 = vector.load %arg4[%c0, %c0_1, %c0_2, %c0_3] : memref<1x1x8x8xf32, #tpu.memory_space<vmem>>, vector<1x1x8x8xf32>
    %4 = vector.shape_cast %3 : vector<1x1x8x8xf32> to vector<8x8xf32>
    %c0_4 = arith.constant 0 : index
    %c0_5 = arith.constant 0 : index
    %c0_6 = arith.constant 0 : index
    %5 = vector.load %arg5[%c0_4, %c0_5, %c0_6] : memref<1x8x16xf32, #tpu.memory_space<vmem>>, vector<1x8x16xf32>
    %6 = vector.shape_cast %5 : vector<1x8x16xf32> to vector<8x16xf32>
    %c0_7 = arith.constant 0 : index
    %c0_8 = arith.constant 0 : index
    %c0_9 = arith.constant 0 : index
    %c0_10 = arith.constant 0 : index
    %7 = vector.load %arg6[%c0_7, %c0_8, %c0_9, %c0_10] : memref<1x1x128x8xf32, #tpu.memory_space<vmem>>, vector<1x1x128x8xf32>
    %8 = vector.shape_cast %7 : vector<1x1x128x8xf32> to vector<128x8xf32>
    %9 = vector.shape_cast %4 : vector<8x8xf32> to vector<8x1x8x1xf32>
    %10 = vector.shape_cast %6 : vector<8x16xf32> to vector<1x8x1x16xf32>
    %11 = vector.broadcast %9 : vector<8x1x8x1xf32> to vector<8x8x8x16xf32>
    %12 = vector.broadcast %10 : vector<1x8x1x16xf32> to vector<8x8x8x16xf32>
    %13 = arith.mulf %11, %12 : vector<8x8x8x16xf32>
    %14 = vector.shape_cast %13 : vector<8x8x8x16xf32> to vector<64x128xf32>
    %c0_11 = arith.constant 0 : index
    %c0_12 = arith.constant 0 : index
    %15 = vector.load %arg8[%c0_11, %c0_12] : memref<64x8xf32, #tpu.memory_space<vmem>>, vector<64x8xf32>
    %cst = arith.constant dense<0.000000e+00> : vector<64x8xf32>
    %16 = tpu.matmul %14, %8, %cst {dimension_numbers = #tpu.dot_dimension_numbers<[1], [0], [0], [1], [0, 0, 1, 1], [], []>} : vector<64x128xf32>, vector<128x8xf32>, vector<64x8xf32> -> vector<64x8xf32>
    %17 = arith.addf %15, %16 : vector<64x8xf32>
    %c0_13 = arith.constant 0 : index
    %c0_14 = arith.constant 0 : index
    %18 = vector.load %arg8[%c0_13, %c0_14] : memref<64x8xf32, #tpu.memory_space<vmem>>, vector<64x8xf32>
    tpu.vector_store %arg8[%c0_13, %c0_14], %17 {strides = array<i32>} : memref<64x8xf32, #tpu.memory_space<vmem>>, vector<64x8xf32>,
    %c1_i32 = arith.constant 1 : i32
    %19 = arith.cmpi eq, %arg1, %c1_i32 : i32
    %20 = arith.extui %19 : i1 to i32
    %c0_i32_15 = arith.constant 0 : i32
    %21 = arith.cmpi ne, %20, %c0_i32_15 : i32
    scf.if %21 {
      %c0_16 = arith.constant 0 : index
      %c0_17 = arith.constant 0 : index
      %22 = vector.load %arg8[%c0_16, %c0_17] : memref<64x8xf32, #tpu.memory_space<vmem>>, vector<64x8xf32>
      %c0_18 = arith.constant 0 : index
      %c0_19 = arith.constant 0 : index
      %c0_20 = arith.constant 0 : index
      %23 = vector.load %arg7[%c0_18, %c0_19, %c0_20] : memref<1x64x8xf32, #tpu.memory_space<vmem>>, vector<1x64x8xf32>
      %24 = vector.shape_cast %23 : vector<1x64x8xf32> to vector<64x8xf32>
      %25 = vector.shape_cast %22 : vector<64x8xf32> to vector<1x64x8xf32>
      tpu.vector_store %arg7[%c0_18, %c0_19, %c0_20], %25 {strides = array<i32>} : memref<1x64x8xf32, #tpu.memory_space<vmem>>, vector<1x64x8xf32>,
    } else {
    }
    return
  }
  func.func @transform_0(%arg0: i32, %arg1: i32, %arg2: memref<5xi32, #tpu.memory_space<smem>>, %arg3: memref<5xi32, #tpu.memory_space<smem>>) -> (i32, i32, i32, i32) {
    %0 = arith.index_cast %arg0 : i32 to index
    %1 = memref.load %arg3[%0] : memref<5xi32, #tpu.memory_space<smem>>
    %2 = arith.addi %1, %arg1 : i32
    %c0_i32 = arith.constant 0 : i32
    %c0_i32_0 = arith.constant 0 : i32
    %c0_i32_1 = arith.constant 0 : i32
    return %arg0, %2, %c0_i32, %c0_i32_0 : i32, i32, i32, i32
  }
  func.func @transform_1(%arg0: i32, %arg1: i32, %arg2: memref<5xi32, #tpu.memory_space<smem>>, %arg3: memref<5xi32, #tpu.memory_space<smem>>) -> (i32, i32, i32) {
    %c0_i32 = arith.constant 0 : i32
    %c0_i32_0 = arith.constant 0 : i32
    %c0_i32_1 = arith.constant 0 : i32
    return %arg0, %c0_i32, %c0_i32_0 : i32, i32, i32
  }
  func.func @transform_2(%arg0: i32, %arg1: i32, %arg2: memref<5xi32, #tpu.memory_space<smem>>, %arg3: memref<5xi32, #tpu.memory_space<smem>>) -> (i32, i32, i32, i32) {
    %0 = arith.index_cast %arg0 : i32 to index
    %1 = memref.load %arg2[%0] : memref<5xi32, #tpu.memory_space<smem>>
    %2 = arith.index_cast %arg0 : i32 to index
    %3 = memref.load %arg3[%2] : memref<5xi32, #tpu.memory_space<smem>>
    %4 = arith.addi %3, %arg1 : i32
    %c0_i32 = arith.constant 0 : i32
    %c0_i32_0 = arith.constant 0 : i32
    %c0_i32_1 = arith.constant 0 : i32
    return %1, %4, %c0_i32, %c0_i32_0 : i32, i32, i32, i32
  }
  func.func @transform_3(%arg0: i32, %arg1: i32, %arg2: memref<5xi32, #tpu.memory_space<smem>>, %arg3: memref<5xi32, #tpu.memory_space<smem>>) -> (i32, i32, i32) {
    %c0_i32 = arith.constant 0 : i32
    %c0_i32_0 = arith.constant 0 : i32
    %c0_i32_1 = arith.constant 0 : i32
    return %arg0, %c0_i32, %c0_i32_0 : i32, i32, i32
  }
}

</mosaic_0001>

<bundles_post_ra>
// kernel: tpu_custom_call.1
= control target key start
LH: loop header
LB: loop body
LE: loop exit
PB: predicated region body
PF: predicated region fallthrough
CT: control target
= control target key end

     0   :  { %s2172_s24 = smov [#allocation4]   ;;  %s2173_s25 = smov [#allocation5]   ;;  %s3258_s0 = inlined_call_operand.vmem [shape: s32[5], index: 0, kind: input, shape index: {}]   ;;  %s3259_s2 = inlined_call_operand.vmem [shape: f32[5,2,8,8], index: 2, kind: input, shape index: {}]   ;;  %s3260_s3 = inlined_call_operand.vmem [shape: f32[5,8,16], index: 3, kind: input, shape index: {}]   ;;  %s3261_s4 = inlined_call_operand.vmem [shape: f32[2,2,128,8], index: 4, kind: input, shape index: {}]   ;;  %s3262_s5 = inlined_call_operand.vmem [shape: f32[5,64,8], index: 5, kind: output, shape index: {}]   ;;  %s3263_s1 = inlined_call_operand.vmem [shape: s32[5], index: 1, kind: input, shape index: {}]  }
   0x1   :  { %s11_s20 = sshll.u32 %s3258_s0, 4  ;;  %s16_s23 = sshll.u32 %s3263_s1, 4  ;;  %s12_s20 = int_to_ptr.vmem [resolvable:$true] %s11_s20  ;;  %s17_s23 = int_to_ptr.vmem [resolvable:$true] %s16_s23 }
   0x2   :  { %14 = dma.vmem_to_smem %s12_s20, 16, %s2172_s24, [#allocation3] }
   0x3   :  { %19 = dma.vmem_to_smem %s17_s23, 16, %s2173_s25, [#allocation3] }
   0x4   :  { %2150 = dma.done.wait [#allocation3], 32 }
   0x5   :  { %2151 = vsyncadd [#allocation3], 4294967264 }
   0x6   :  { %22 = sfence }
   0x7   :  { %s2220_s26 = smov 0   ;;  %s2222_s27 = smov 0  }
   0x8   :  { %s2224_s28 = smov 0   ;;  %s2226_s0 = smov 0  }
   0x9   :  { %s2228_s29 = smov 0  }
   0xa LB: > { %s37_s1 = sadd.s32 1, %s2162_s28  ;;  %s40_s30 = sadd.s32 1, %s2166_s0  ;;  %s2170_s29 = sphi %s2228_s29, %s28_s29   ;;  %s2166_s0 = sphi %s2226_s0, %s3434_s0   ;;  %s2162_s28 = sphi %s2224_s28, %s3433_s28   ;;  %s2158_s27 = sphi %s2222_s27, %s3432_s27   ;;  %s2154_s26 = sphi %s2220_s26, %s3431_s26  }
   0xb   : > { %p38_p0 = scmp.ge.s32.totalorder %s37_s1, 2  ;;  %p1849_p1 = scmp.ge.s32.totalorder %s2170_s29, 1 }
   0xc   : > { %p214_p2 = scmp.lt.s32.totalorder %s2170_s29, 11 }
   0xd   : > { %s3436_s1 = smov (%p38_p0, %s37_s1), 0  ;;  %s3438_s30 = smov (!%p38_p0, %s40_s30), %s2166_s0 }
   0xe   : > { %p215_p3 = pnand %p1849_p1, %p214_p2  ;;  %p42_p4 = scmp.ge.s32.totalorder %s3438_s30, 5 }
  0x10   : > { %s3440_s30 = smov (%p42_p4, %s3438_s30), 0  ;;  %218 = sbr.rel (%p215_p3) target bundleno = 587 (0x24b), region = 32 }
  0x15   : > { %s259_s6 = sld [smem:[#allocation5 + %s2158_s27]]  ;;  %p261_p5 = scmp.lt.s32.totalorder %s2158_s27, 4 }
  0x16   : > { %s275_s7 = sld [smem:[#allocation4 + %s2158_s27]]  ;;  %p1858_p9 = scmp.ne.s32.totalorder %s2154_s26, 0 }
  0x17   : > { %s262_s8 = scalar_select %p261_p5, %s2158_s27, 4 }
  0x18   : > { %s276_s9 = sld [smem:[#allocation5 + %s2158_s27]] }
  0x19   : > { %s1852_s10 = sshll.u32 %s262_s8, 3  ;;  %s1862_s14 = sshll.u32 %s262_s8, 6 }
  0x1a   : > { %s2255_s13 = scalar_lea.vmem %s3260_s3, %s1852_s10  ;;  %s2261_s18 = scalar_lea.vmem %s3262_s5, %s1862_s14 }
  0x1b   : > { %s260_s15 = sadd.s32 %s2154_s26, %s259_s6  ;;  %s1850_s19 = sshll.u32 %s262_s8, 1 }
  0x1c   : > { %p263_p6 = scmp.lt.s32.totalorder %s260_s15, 1  ;;  %p278_p7 = scmp.lt.s32.totalorder %s275_s7, 1 }
  0x1e   : > { %s3442_s15 = smov (!%p263_p6, %s260_s15), 1  ;;  %s277_s20 = sadd.s32 %s2154_s26, %s276_s9 }
  0x1f   : > { %s266_s21 = sadd.s32 %s1850_s19, %s3442_s15  ;;  %p280_p8 = scmp.lt.s32.totalorder %s277_s20, 1 }
  0x20   : > { %s1851_s22 = sshll.u32 %s266_s21, 3  ;;  %s3444_s7 = smov (!%p278_p7, %s275_s7), 1 }
  0x21   : > { %s268_s25 = scalar_lea.vmem %s3259_s2, %s1851_s22  ;;  %s3446_s20 = smov (!%p280_p8, %s277_s20), 1 }
  0x22   : > { %s1854_s27 = sshll.u32 %s3444_s7, 5  ;;  %s1853_s6 = sshll.u32 %s3446_s20, 4 }
  0x23   : > { %s284_s10 = sadd.s32 %s1854_s27, %s1853_s6  ;;  %298 = sbr.rel (%p1858_p9) target bundleno = 49 (0x31), region = 36 }
  0x24   : > { %s1855_s11 = sshll.u32 %s284_s10, 3 }
  0x25   : > { %s2270_s8 = scalar_lea.vmem %s3261_s4, %s1855_s11 }
  0x28   : > { %vm299_vm0 = vcmask 64512   ;;  %v2174_v0 = vmov 0.0  }
  0x29   : > { %300 = vst.msk [vmem:[#allocation2] sm:$0xff] %vm299_vm0, %v2174_v0 }
  0x2a   : > { %301 = vst.msk [vmem:[#allocation2 + $0x8] sm:$0xff] %vm299_vm0, %v2174_v0 }
  0x2b   : > { %302 = vst.msk [vmem:[#allocation2 + $0x10] sm:$0xff] %vm299_vm0, %v2174_v0 }
  0x2c   : > { %303 = vst.msk [vmem:[#allocation2 + $0x18] sm:$0xff] %vm299_vm0, %v2174_v0 }
  0x2d   : > { %304 = vst.msk [vmem:[#allocation2 + $0x20] sm:$0xff] %vm299_vm0, %v2174_v0 }
  0x2e   : > { %305 = vst.msk [vmem:[#allocation2 + $0x28] sm:$0xff] %vm299_vm0, %v2174_v0 }
  0x2f   : > { %306 = vst.msk [vmem:[#allocation2 + $0x30] sm:$0xff] %vm299_vm0, %v2174_v0 }
  0x30   : > { %307 = vst.msk [vmem:[#allocation2 + $0x38] sm:$0xff] %vm299_vm0, %v2174_v0 }
  0x31 PF: > { %v327_v1 = vlaneseq  ;;  %v308_v3 = vld [vmem:[%s268_s25] sm:$0xff]  ;;  %v2175_v27 = vmov 1983009808   ;;  %v2176_v29 = vmov 1934713408   ;;  %vm471_vm1 = vcmask 1047556  }
  0x32   : > { %v354_v4 = vperm.slane %v308_v3, 4  ;;  %v326_v5 = vperm.slane %v308_v3, 0  ;;  %v361_v6 = vperm.slane %v308_v3, 5  ;;  %v368_v7 = vperm.slane %v308_v3, 6  ;;  %v309_v12 = vld [vmem:[%s2255_s13] sm:$0xff]  ;;  %s2177_s7 = smov 16  }
  0x33   : > { %v328_v2 = vshrl.u32 %v327_v1, 7  ;;  %v340_v8 = vperm.slane %v308_v3, 2  ;;  %v375_v9 = vperm.slane %v308_v3, 7  ;;  %v333_v10 = vperm.slane %v308_v3, 1  ;;  %s2178_s9 = smov 32   ;;  %s2179_s13 = smov 48  }
  0x34   : > { %v347_v11 = vperm.slane %v308_v3, 3  ;;  %v383_v14 = vrot.slane %v309_v12, 1  ;;  %v384_v15 = vrot.slane %v309_v12, 2  ;;  %v388_v16 = vrot.slane %v309_v12, 6  ;;  %s2180_s15 = smov 80   ;;  %s2181_s16 = smov 64  }
  0x35   : > { %1964 = vset.pattern.permute.xlu1 %v328_v2  ;;  %1963 = vset.pattern.permute.xlu0 %v328_v2  ;;  %v387_v17 = vrot.slane %v309_v12, 5  ;;  %v389_v18 = vrot.slane %v309_v12, 7  ;;  %v385_v19 = vrot.slane %v309_v12, 3  ;;  %v386_v20 = vrot.slane %v309_v12, 4  ;;  %s2182_s17 = smov 96   ;;  %s2183_s19 = smov 112  }
  0x36   : > { %1965 = vset.pattern.permute.xlu2 %v328_v2  ;;  %v2274_v21 = vperm.slane %v309_v12, 0  ;;  %v2276_v22 = vperm.slane %v383_v14, 0  ;;  %v2278_v23 = vperm.slane %v384_v15, 0  ;;  %v2280_v24 = vperm.slane %v388_v16, 0  ;;  %p1859_p10 = scmp.ne.s32.totalorder %s2154_s26, 1 }
  0x37   : > { %v2282_v25 = vperm.slane %v387_v17, 0  ;;  %v2284_v26 = vperm.slane %v389_v18, 0  ;;  %v476_v28 = vunpack.c.l.s4 %v2175_v27  ;;  %v524_v30 = vunpack.c.l.s4 %v2176_v29 }
  0x38   : > { %v2298_v35 = vperm.slane %v385_v19, 0  ;;  %v2300_v36 = vperm.slane %v386_v20, 0  ;;  %vm1591_vm2 = vcmask 130048   ;;  %vm1600_vm3 = vcmask 261120  }
  0x39   : > { %v2314_v42 = vunpack.c.0.s8 %v476_v28  ;;  %v2316_v43 = vunpack.c.0.s8 %v524_v30  ;;  %vm1609_vm4 = vcmask 392192   ;;  %vm1618_vm5 = vcmask 523264  }
  0x3a   : > { %vm1627_vm6 = vcmask 654336   ;;  %vm1636_vm7 = vcmask 785408   ;;  %vm1645_vm8 = vcmask 916480   ;;  %vm1711_vm9 = vcmask 64512  }
  0x3d   : > { %359 = vperm.xlu0 %1963, %v354_v4   ;;  %331 = vperm.xlu1 %1964, %v326_v5  }
  0x3e   : > { %366 = vperm.xlu2 %1965, %v361_v6  }
  0x45   : > { %373 = vperm.xlu0 %1963, %v368_v7   ;;  %345 = vperm.xlu1 %1964, %v340_v8  }
  0x46   : > { %380 = vperm.xlu2 %1965, %v375_v9  }
  0x4d   : > { %338 = vperm.xlu0 %1963, %v333_v10   ;;  %352 = vperm.xlu1 %1964, %v347_v11  }
  0x98   : > { %v367_v13 = vpop.permute.xlu2 %366 }
  0x99   : > { %v2287_v31 = vmul.f32 %v2274_v21, %v367_v13  ;;  %v2290_v32 = vmul.f32 %v2276_v22, %v367_v13  ;;  %v2293_v33 = vmul.f32 %v2278_v23, %v367_v13  ;;  %v2296_v34 = vmul.f32 %v2280_v24, %v367_v13 }
  0x9a   : > { %v2303_v37 = vmul.f32 %v2282_v25, %v367_v13  ;;  %v2306_v38 = vmul.f32 %v2284_v26, %v367_v13  ;;  %v2309_v40 = vmul.f32 %v2298_v35, %v367_v13  ;;  %v2312_v41 = vmul.f32 %v2300_v36, %v367_v13 }
  0x9b   : > { %3319 = vst [vmem:[#allocation7_spill] sm:$0xff] %v2287_v31 }
  0x9c   : > { %3320 = vst [vmem:[#allocation8_spill] sm:$0xff] %v2290_v32 }
  0x9d   : > { %3321 = vst [vmem:[#allocation9_spill] sm:$0xff] %v2293_v33 }
  0x9e   : > { %3322 = vst [vmem:[#allocation10_spill] sm:$0xff] %v2296_v34 }
  0x9f   : > { %3323 = vst [vmem:[#allocation11_spill] sm:$0xff] %v2303_v37 }
  0xa0   : > { %3324 = vst [vmem:[#allocation12_spill] sm:$0xff] %v2306_v38  ;;  %v381_v39 = vpop.permute.xlu2 %380 }
  0xa1   : > { %3325 = vst [vmem:[#allocation13_spill] sm:$0xff] %v2309_v40  ;;  %v2323_v48 = vmul.f32 %v2274_v21, %v381_v39  ;;  %v2326_v49 = vmul.f32 %v2276_v22, %v381_v39  ;;  %v2329_v50 = vmul.f32 %v2278_v23, %v381_v39  ;;  %v2332_v51 = vmul.f32 %v2280_v24, %v381_v39 }
  0xa2   : > { %3326 = vst [vmem:[#allocation14_spill] sm:$0xff] %v2312_v41  ;;  %v2337_v56 = vmul.f32 %v2282_v25, %v381_v39  ;;  %v2340_v57 = vmul.f32 %v2284_v26, %v381_v39  ;;  %v2349_v60 = vmul.f32 %v2298_v35, %v381_v39  ;;  %v2352_v61 = vmul.f32 %v2300_v36, %v381_v39 }
  0xa3   : > { %3327 = vst [vmem:[#allocation15_spill] sm:$0xff] %v2323_v48 }
  0xa4   : > { %3328 = vst [vmem:[#allocation16_spill] sm:$0xff] %v2326_v49 }
  0xa5   : > { %3329 = vst [vmem:[#allocation17_spill] sm:$0xff] %v2329_v50 }
  0xa6   : > { %3330 = vst [vmem:[#allocation18_spill] sm:$0xff] %v2332_v51 }
  0xa7   : > { %3331 = vst [vmem:[#allocation19_spill] sm:$0xff] %v2337_v56 }
  0xa8   : > { %3332 = vst [vmem:[#allocation20_spill] sm:$0xff] %v2340_v57 }
  0xa9   : > { %3333 = vst [vmem:[#allocation21_spill] sm:$0xff] %v2349_v60 }
  0xaa   : > { %3334 = vst [vmem:[#allocation22_spill] sm:$0xff] %v2352_v61 }
  0xaf   : > { %v360_v52 = vpop.permute.xlu0 %359  ;;  %v332_v53 = vpop.permute.xlu1 %331 }
  0xb0   : > { %v2343_v58 = vmul.f32 %v2278_v23, %v360_v52  ;;  %v2346_v59 = vmul.f32 %v2298_v35, %v360_v52  ;;  %v2355_v62 = vmul.f32 %v2276_v22, %v360_v52  ;;  %v2358_v63 = vmul.f32 %v2300_v36, %v360_v52 }
  0xb1   : > { %v2361_v0 = vmul.f32 %v2282_v25, %v360_v52  ;;  %v2364_v1 = vmul.f32 %v2284_v26, %v360_v52  ;;  %v2371_v6 = vmul.f32 %v2274_v21, %v332_v53  ;;  %v2374_v7 = vmul.f32 %v2276_v22, %v332_v53 }
  0xb2   : > { %v2379_v10 = vmul.f32 %v2274_v21, %v360_v52  ;;  %v2382_v11 = vmul.f32 %v2280_v24, %v360_v52  ;;  %v919_v12 = vrot.slane %v2343_v58, 4  ;;  %v931_v13 = vrot.slane %v2346_v59, 4 }
  0xb3   : > { %v955_v16 = vrot.slane %v2364_v1, 4  ;;  %v2391_v18 = vmul.f32 %v2278_v23, %v332_v53  ;;  %v2394_v19 = vmul.f32 %v2282_v25, %v332_v53  ;;  %v2397_v20 = vmul.f32 %v2280_v24, %v332_v53 }
  0xb4   : > { %v2400_v27 = vmul.f32 %v2284_v26, %v332_v53  ;;  %v2403_v28 = vmul.f32 %v2298_v35, %v332_v53  ;;  %v2406_v29 = vmul.f32 %v2300_v36, %v332_v53  ;;  %v920_v55 = vsel %vm471_vm1, %v919_v12, %v2379_v10 }
  0xb5   : > { %v932_v46 = vsel %vm471_vm1, %v931_v13, %v2355_v62  ;;  %v2443_v47 = vperm.slane %v920_v55, %v2314_v42  ;;  %v956_v48 = vsel %vm471_vm1, %v955_v16, %v2361_v0  ;;  %v943_v37 = vrot.slane %v2382_v11, 4 }
  0xb6   : > { %v2446_v44 = vperm.slane %v932_v46, %v2314_v42  ;;  %v962_v31 = vperm.slane %v956_v48, %v2314_v42 }
  0xb7   : > { %v374_v52 = vpop.permute.xlu0 %373  ;;  %v346_v9 = vpop.permute.xlu1 %345  ;;  %v944_v48 = vsel %vm471_vm1, %v943_v37, %v2358_v63 }
  0xb8   : > { %v2411_v4 = vmul.f32 %v2278_v23, %v374_v52  ;;  %v2414_v3 = vmul.f32 %v2298_v35, %v374_v52  ;;  %v2421_v53 = vmul.f32 %v2276_v22, %v374_v52  ;;  %v2424_v45 = vmul.f32 %v2300_v36, %v374_v52 }
  0xb9   : > { %v2427_v39 = vmul.f32 %v2282_v25, %v374_v52  ;;  %v2430_v30 = vmul.f32 %v2284_v26, %v374_v52  ;;  %v2437_v2 = vmul.f32 %v2274_v21, %v346_v9  ;;  %v2440_v54 = vmul.f32 %v2276_v22, %v346_v9 }
  0xba   : > { %v2449_v8 = vmul.f32 %v2274_v21, %v374_v52  ;;  %v2452_v5 = vmul.f32 %v2280_v24, %v374_v52  ;;  %v1143_v13 = vrot.slane %v2411_v4, 4  ;;  %v1155_v12 = vrot.slane %v2414_v3, 4 }
  0xbb   : > { %3335 = vst [vmem:[#allocation23_spill] sm:$0xff] %v2440_v54  ;;  %v1179_v55 = vrot.slane %v2430_v30, 4  ;;  %v2461_v46 = vmul.f32 %v2278_v23, %v346_v9  ;;  %v2464_v49 = vmul.f32 %v2282_v25, %v346_v9  ;;  %v2467_v52 = vmul.f32 %v2280_v24, %v346_v9 }
  0xbc   : > { %v2470_v57 = vmul.f32 %v2284_v26, %v346_v9  ;;  %v2473_v17 = vmul.f32 %v2298_v35, %v346_v9  ;;  %v2476_v15 = vmul.f32 %v2300_v36, %v346_v9  ;;  %v967_v54 = vrot.slane %v2446_v44, 4 }
  0xbe   : > { %3336 = vst [vmem:[#allocation24_spill] sm:$0xff] %v2476_v15  ;;  %v968_v37 = vsel %vm471_vm1, %v967_v54, %v2443_v47  ;;  %v1180_v54 = vsel %vm471_vm1, %v1179_v55, %v2427_v39 }
  0xbf   : > { %v339_v51 = vpop.permute.xlu0 %338  ;;  %v353_v38 = vpop.permute.xlu1 %352 }
  0xc0   : > { %v2481_v61 = vmul.f32 %v2276_v22, %v339_v51  ;;  %v2484_v60 = vmul.f32 %v2278_v23, %v339_v51  ;;  %v2487_v50 = vmul.f32 %v2298_v35, %v339_v51  ;;  %v2492_v9 = vmul.f32 %v2300_v36, %v339_v51 }
  0xc1   : > { %v2495_v14 = vmul.f32 %v2282_v25, %v339_v51  ;;  %v2498_v56 = vmul.f32 %v2284_v26, %v339_v51  ;;  %v2506_v40 = vmul.f32 %v2274_v21, %v339_v51  ;;  %v2509_v33 = vmul.f32 %v2280_v24, %v339_v51 }
  0xc2   : > { %3337 = vst [vmem:[#allocation25_spill] sm:$0xff] %v2492_v9  ;;  %v2517_v32 = vmul.f32 %v2274_v21, %v353_v38  ;;  %v2528_v15 = vmul.f32 %v2278_v23, %v353_v38  ;;  %v2531_v41 = vmul.f32 %v2298_v35, %v353_v38  ;;  %v2534_v21 = vmul.f32 %v2300_v36, %v353_v38 }
  0xc3   : > { %3338 = vst [vmem:[#allocation26_spill] sm:$0xff] %v2495_v14  ;;  %v2537_v16 = vmul.f32 %v2282_v25, %v353_v38  ;;  %v950_v51 = vperm.slane %v944_v48, %v2314_v42  ;;  %v1144_v23 = vsel %vm471_vm1, %v1143_v13, %v2449_v8  ;;  %v1156_v35 = vsel %vm471_vm1, %v1155_v12, %v2421_v53 }
  0xc4   : > { %3339 = vst [vmem:[#allocation27_spill] sm:$0xff] %v2498_v56  ;;  %v1167_v36 = vrot.slane %v2452_v5, 4  ;;  %v1150_v34 = vperm.slane %v1144_v23, %v2314_v42  ;;  %v1162_v48 = vperm.slane %v1156_v35, %v2314_v42  ;;  %v1186_v13 = vperm.slane %v1180_v54, %v2314_v42 }
  0xc5   : > { %3340 = vst [vmem:[#allocation28_spill] sm:$0xff] %v2506_v40  ;;  %v991_v40 = vrot.slane %v962_v31, 4  ;;  %v969_v23 = vrot.slane %v2443_v47, 4  ;;  %v993_v35 = vrot.slane %v950_v51, 4 }
  0xc6   : > { %3341 = vst [vmem:[#allocation29_spill] sm:$0xff] %v2509_v33  ;;  %v2525_v33 = vmul.f32 %v2276_v22, %v353_v38  ;;  %v2543_v22 = vperm.slane %v968_v37, %v2316_v43  ;;  %v2556_v37 = vmul.f32 %v2280_v24, %v353_v38  ;;  %v1168_v12 = vsel %vm471_vm1, %v1167_v36, %v2424_v45 }
  0xc7   : > { %3342 = vst [vmem:[#allocation30_spill] sm:$0xff] %v2517_v32  ;;  %v992_v25 = vsel %vm471_vm1, %v991_v40, %v950_v51  ;;  %v1174_v40 = vperm.slane %v1168_v12, %v2314_v42  ;;  %v1215_v55 = vrot.slane %v1186_v13, 4  ;;  %v994_v36 = vsel %vm471_vm1, %v962_v31, %v993_v35 }
  0xc8   : > { %3343 = vst [vmem:[#allocation31_spill] sm:$0xff] %v2525_v33  ;;  %v2567_v9 = vperm.slane %v992_v25, %v2316_v43  ;;  %v1017_v24 = vrot.slane %v2543_v22, 4  ;;  %v1002_v25 = vperm.slane %v994_v36, %v2316_v43 }
  0xc9   : > { %3344 = vst [vmem:[#allocation32_spill] sm:$0xff] %v2528_v15  ;;  %v1217_v54 = vrot.slane %v1174_v40, 4  ;;  %v1216_v47 = vsel %vm471_vm1, %v1215_v55, %v1174_v40 }
  0xca   : > { %3345 = vst [vmem:[#allocation33_spill] sm:$0xff] %v2534_v21  ;;  %v2559_v21 = vmul.f32 %v2284_v26, %v353_v38  ;;  %v970_v38 = vsel %vm471_vm1, %v2446_v44, %v969_v23  ;;  %v921_v44 = vrot.slane %v2379_v10, 4  ;;  %v1019_v23 = vrot.slane %v1002_v25, 4 }
  0xcb   : > { %3346 = vst [vmem:[#allocation34_spill] sm:$0xff] %v2537_v16  ;;  %v1191_v16 = vrot.slane %v1162_v48, 4  ;;  %v978_v51 = vperm.slane %v970_v38, %v2316_v43  ;;  %v1018_v55 = vsel %vm471_vm1, %v2567_v9, %v1017_v24 }
  0xcc   : > { %3347 = vst [vmem:[#allocation35_spill] sm:$0xff] %v2543_v22  ;;  %v2581_v22 = vperm.slane %v1216_v47, %v2316_v43  ;;  %v922_v38 = vsel %vm471_vm1, %v2343_v58, %v921_v44 }
  0xcd   : > { %3348 = vst [vmem:[#allocation36_spill] sm:$0xff] %v2556_v37  ;;  %v1193_v37 = vrot.slane %v1150_v34, 4  ;;  %v1192_v26 = vsel %vm471_vm1, %v1191_v16, %v1150_v34  ;;  %v1218_v16 = vsel %vm471_vm1, %v1186_v13, %v1217_v54  ;;  %v1020_v13 = vsel %vm471_vm1, %v1019_v23, %v978_v51 }
  0xce   : > { %3349 = vst [vmem:[#allocation37_spill] sm:$0xff] %v2567_v9  ;;  %v2575_v12 = vperm.slane %v1192_v26, %v2316_v43  ;;  %v1226_v40 = vperm.slane %v1218_v16, %v2316_v43  ;;  %v1021_v26 = vrot.slane %v978_v51, 4  ;;  %v930_v24 = vperm.slane %v922_v38, %v2314_v42 }
  0xcf   : > { %3351 = vst [vmem:[#allocation39_spill] sm:$0xff] %v2581_v22  ;;  %v1194_v34 = vsel %vm471_vm1, %v1162_v48, %v1193_v37  ;;  %v3352_v48 = vrot.slane %v2355_v62, 4  ;;  %v3354_v51 = vrot.slane %v2361_v0, 4 }
  0xd0   : > { %3350 = vst [vmem:[#allocation38_spill] sm:$0xff] %v2575_v12  ;;  %v1241_v31 = vrot.slane %v2575_v12, 4  ;;  %v1202_v35 = vperm.slane %v1194_v34, %v2316_v43  ;;  %v1243_v36 = vrot.slane %v1226_v40, 4  ;;  %v1022_v34 = vsel %vm471_vm1, %v1002_v25, %v1021_v26 }
  0xd1   : > { %v934_v37 = vsel %vm471_vm1, %v2346_v59, %v3352_v48  ;;  %v3353_v59 = vrot.slane %v2358_v63, 4  ;;  %v1145_v63 = vrot.slane %v2449_v8, 4  ;;  %v3355_v26 = vrot.slane %v2421_v53, 4 }
  0xd2   : > { %v1242_v10 = vsel %vm471_vm1, %v2581_v22, %v1241_v31  ;;  %v1245_v54 = vrot.slane %v1202_v35, 4  ;;  %v942_v16 = vperm.slane %v934_v37, %v2314_v42  ;;  %v1244_v58 = vsel %vm471_vm1, %v1243_v36, %v1202_v35 }
  0xd3   : > { %v1966_v47 = vpack.i.bf16 %v1242_v10, %v1018_v55  ;;  %v946_v44 = vsel %vm471_vm1, %v2382_v11, %v3353_v59  ;;  %v958_v31 = vsel %vm471_vm1, %v2364_v1, %v3354_v51  ;;  %v1971_v25 = vpack.i.bf16 %v1244_v58, %v1020_v13 }
  0xd4   : > { %v1246_v62 = vsel %vm471_vm1, %v1226_v40, %v1245_v54  ;;  %v954_v55 = vperm.slane %v946_v44, %v2314_v42  ;;  %v966_v35 = vperm.slane %v958_v31, %v2314_v42  ;;  %v979_v40 = vrot.slane %v942_v16, 4 }
  0xd5   : > { %1967 = vrot.lane.b32.xlu2 %v1966_v47, %s2177_s7  ;;  %v1976_v23 = vpack.i.bf16 %v1246_v62, %v1022_v34  ;;  %v1158_v0 = vsel %vm471_vm1, %v2414_v3, %v3355_v26  ;;  %v3356_v11 = vrot.slane %v2424_v45, 4  ;;  %1972 = vrot.lane.b32.xlu0 %v1971_v25, %s2178_s9  ;;  %v3357_v53 = vrot.slane %v2427_v39, 4 }
  0xd6   : > { %v1003_v38 = vrot.slane %v966_v35, 4  ;;  %v1166_v48 = vperm.slane %v1158_v0, %v2314_v42  ;;  %v980_v45 = vsel %vm471_vm1, %v979_v40, %v930_v24  ;;  %v981_v10 = vrot.slane %v930_v24, 4 }
  0xd7   : > { %v1170_v1 = vsel %vm471_vm1, %v2452_v5, %v3356_v11  ;;  %1977 = vrot.lane.b32.xlu1 %v1976_v23, %s2179_s13  ;;  %v1182_v3 = vsel %vm471_vm1, %v2430_v30, %v3357_v53  ;;  %v1146_v5 = vsel %vm471_vm1, %v2411_v4, %v1145_v63  ;;  %v986_v13 = vperm.slane %v980_v45, %v2316_v43 }
  0xd8   : > { %v1178_v8 = vperm.slane %v1170_v1, %v2314_v42  ;;  %v1190_v37 = vperm.slane %v1182_v3, %v2314_v42  ;;  %v1004_v36 = vsel %vm471_vm1, %v1003_v38, %v954_v55  ;;  %v1154_v54 = vperm.slane %v1146_v5, %v2314_v42 }
  0xd9   : > { %v1203_v47 = vrot.slane %v1166_v48, 4  ;;  %v1010_v39 = vperm.slane %v1004_v36, %v2316_v43  ;;  %v982_v30 = vsel %vm471_vm1, %v942_v16, %v981_v10  ;;  %v1005_v58 = vrot.slane %v954_v55, 4 }
  0xda   : > { %v1227_v34 = vrot.slane %v1190_v37, 4  ;;  %v1025_v59 = vrot.slane %v986_v13, 4  ;;  %v990_v4 = vperm.slane %v982_v30, %v2316_v43  ;;  %v1205_v44 = vrot.slane %v1154_v54, 4 }
  0xdb   : > { %v1204_v62 = vsel %vm471_vm1, %v1203_v47, %v1154_v54  ;;  %v1023_v24 = vrot.slane %v1010_v39, 4  ;;  %v1006_v25 = vsel %vm471_vm1, %v966_v35, %v1005_v58  ;;  %v1229_v11 = vrot.slane %v1178_v8, 4 }
  0xdc   : > { %v1210_v51 = vperm.slane %v1204_v62, %v2316_v43  ;;  %v1228_v31 = vsel %vm471_vm1, %v1227_v34, %v1178_v8  ;;  %v1026_v40 = vsel %vm471_vm1, %v1010_v39, %v1025_v59  ;;  %v1014_v16 = vperm.slane %v1006_v25, %v2316_v43 }
  0xdd   : > { %v1234_v23 = vperm.slane %v1228_v31, %v2316_v43  ;;  %v1206_v55 = vsel %vm471_vm1, %v1166_v48, %v1205_v44  ;;  %v1024_v63 = vsel %vm471_vm1, %v1023_v24, %v986_v13  ;;  %v1029_v53 = vrot.slane %v990_v4, 4 }
  0xde   : > { %v1249_v26 = vrot.slane %v1210_v51, 4  ;;  %v1214_v0 = vperm.slane %v1206_v55, %v2316_v43  ;;  %v1027_v38 = vrot.slane %v1014_v16, 4  ;;  %v3358_v35 = vrot.slane %v2391_v18, 4 }
  0xdf   : > { %v1247_v1 = vrot.slane %v1234_v23, 4  ;;  %v1230_v5 = vsel %vm471_vm1, %v1190_v37, %v1229_v11  ;;  %v1030_v39 = vsel %vm471_vm1, %v1014_v16, %v1029_v53  ;;  %v483_v34 = vrot.slane %v2403_v28, 4 }
  0xe0   : > { %v472_v3 = vsel %vm471_vm1, %v3358_v35, %v2371_v6  ;;  %v1250_v45 = vsel %vm471_vm1, %v1234_v23, %v1249_v26  ;;  %v1253_v10 = vrot.slane %v1214_v0, 4  ;;  %v1028_v8 = vsel %vm471_vm1, %v1027_v38, %v990_v4  ;;  %v3362_v38 = vld [vmem:[#allocation24_spill] sm:$0xff] }
  0xe1   : > { %v478_v48 = vperm.slane %v472_v3, %v2314_v42  ;;  %v1248_v13 = vsel %vm471_vm1, %v1247_v1, %v1210_v51  ;;  %v1986_v36 = vpack.i.bf16 %v1250_v45, %v1026_v40  ;;  %v1238_v54 = vperm.slane %v1230_v5, %v2316_v43 }
  0xe2   : > { %v1981_v47 = vpack.i.bf16 %v1248_v13, %v1024_v63  ;;  %v3359_v30 = vrot.slane %v2397_v20, 4  ;;  %v3360_v4 = vrot.slane %v2400_v27, 4  ;;  %v484_v51 = vsel %vm471_vm1, %v483_v34, %v2374_v7 }
  0xe3   : > { %1987 = vrot.lane.b32.xlu0 %v1986_v36, %s2180_s15  ;;  %v1251_v58 = vrot.slane %v1238_v54, 4  ;;  %v1254_v62 = vsel %vm471_vm1, %v1238_v54, %v1253_v10  ;;  %v521_v25 = vrot.slane %v478_v48, 4  ;;  %v490_v40 = vperm.slane %v484_v51, %v2314_v42 }
  0xe4   : > { %v496_v37 = vsel %vm471_vm1, %v3359_v30, %v2406_v29  ;;  %v508_v44 = vsel %vm471_vm1, %v3360_v4, %v2394_v19  ;;  %1982 = vrot.lane.b32.xlu2 %v1981_v47, %s2181_s16  ;;  %v2001_v24 = vpack.i.bf16 %v1254_v62, %v1030_v39  ;;  %v3361_v55 = vrot.slane %v2461_v46, 4 }
  0xe5   : > { %v502_v59 = vperm.slane %v496_v37, %v2314_v42  ;;  %v514_v31 = vperm.slane %v508_v44, %v2314_v42  ;;  %v1252_v23 = vsel %vm471_vm1, %v1251_v58, %v1214_v0  ;;  %v707_v1 = vrot.slane %v2473_v17, 4 }
  0xe6   : > { %v696_v63 = vsel %vm471_vm1, %v3361_v55, %v2437_v2  ;;  %v1991_v26 = vpack.i.bf16 %v1252_v23, %v1028_v8  ;;  %v3363_v53 = vrot.slane %v2467_v52, 4  ;;  %v522_v0 = vsel %vm471_vm1, %v490_v40, %v521_v25  ;;  %v3365_v8 = vld [vmem:[#allocation23_spill] sm:$0xff] }
  0xe7   : > { %v545_v16 = vrot.slane %v502_v59, 4  ;;  %v702_v11 = vperm.slane %v696_v63, %v2314_v42  ;;  %v3364_v5 = vrot.slane %v2470_v57, 4  ;;  %v530_v13 = vperm.slane %v522_v0, %v2316_v43  ;;  %v3388_v55 = vld [vmem:[#allocation19_spill] sm:$0xff] }
  0xe8   : > { %v720_v35 = vsel %vm471_vm1, %v3363_v53, %v3362_v38  ;;  %1992 = vrot.lane.b32.xlu1 %v1991_v26, %s2182_s17  ;;  %v708_v54 = vsel %vm471_vm1, %v707_v1, %v3365_v8  ;;  %v519_v37 = vrot.slane %v490_v40, 4  ;;  %v543_v62 = vrot.slane %v514_v31, 4 }
  0xe9   : > { %v546_v3 = vsel %vm471_vm1, %v514_v31, %v545_v16  ;;  %v726_v45 = vperm.slane %v720_v35, %v2314_v42  ;;  %v732_v10 = vsel %vm471_vm1, %v3364_v5, %v2464_v49  ;;  %v714_v39 = vperm.slane %v708_v54, %v2314_v42  ;;  %v3369_v54 = vld [vmem:[#allocation7_spill] sm:$0xff] }
  0xea   : > { %v554_v36 = vperm.slane %v546_v3, %v2316_v43  ;;  %v738_v47 = vperm.slane %v732_v10, %v2314_v42  ;;  %v745_v34 = vrot.slane %v702_v11, 4  ;;  %v573_v44 = vrot.slane %v530_v13, 4 }
  0xeb   : > { %v769_v30 = vrot.slane %v726_v45, 4  ;;  %2002 = vrot.lane.b32.xlu0 %v2001_v24, %s2183_s19  ;;  %v520_v23 = vsel %vm471_vm1, %v519_v37, %v478_v48  ;;  %v743_v16 = vrot.slane %v714_v39, 4  ;;  %v544_v24 = vsel %vm471_vm1, %v543_v62, %v502_v59 }
  0xec   : > { %v571_v58 = vrot.slane %v554_v36, 4  ;;  %v767_v4 = vrot.slane %v738_v47, 4  ;;  %v746_v51 = vsel %vm471_vm1, %v714_v39, %v745_v34  ;;  %v2714_v31 = vperm.slane %v520_v23, %v2316_v43 }
  0xed   : > { %v770_v25 = vsel %vm471_vm1, %v738_v47, %v769_v30  ;;  %v754_v63 = vperm.slane %v746_v51, %v2316_v43  ;;  %v744_v1 = vsel %vm471_vm1, %v743_v16, %v702_v11  ;;  %v2721_v48 = vperm.slane %v544_v24, %v2316_v43  ;;  %v3372_v11 = vld [vmem:[#allocation13_spill] sm:$0xff]  ;;  %v3375_v16 = vld [vmem:[#allocation14_spill] sm:$0xff] }
  0xee   : > { %v778_v40 = vperm.slane %v770_v25, %v2316_v43  ;;  %3366 = vst [vmem:[#allocation24_spill] sm:$0xff] %v2714_v31  ;;  %v572_v26 = vsel %vm471_vm1, %v571_v58, %v530_v13  ;;  %v768_v53 = vsel %vm471_vm1, %v767_v4, %v726_v45  ;;  %v569_v0 = vrot.slane %v2714_v31, 4  ;;  %v3370_v13 = vld [vmem:[#allocation9_spill] sm:$0xff]  ;;  %v3374_v25 = vld [vmem:[#allocation8_spill] sm:$0xff] }
  0xef   : > { %3367 = vst [vmem:[#allocation23_spill] sm:$0xff] %v2721_v48  ;;  %v2725_v3 = vperm.slane %v744_v1, %v2316_v43  ;;  %v574_v5 = vsel %vm471_vm1, %v554_v36, %v573_v44  ;;  %v797_v10 = vrot.slane %v754_v63, 4  ;;  %v3371_v47 = vrot.slane %v3370_v13, 4 }
  0xf0   : > { %v795_v35 = vrot.slane %v778_v40, 4  ;;  %v1043_v39 = vrot.slane %v3372_v11, 4  ;;  %v570_v34 = vsel %vm471_vm1, %v2721_v48, %v569_v0  ;;  %v2737_v30 = vperm.slane %v768_v53, %v2316_v43  ;;  %v3379_v0 = vld [vmem:[#allocation12_spill] sm:$0xff] }
  0xf1   : > { %3368 = vst [vmem:[#allocation40_spill] sm:$0xff] %v2725_v3  ;;  %v1032_v59 = vsel %vm471_vm1, %v3371_v47, %v3369_v54  ;;  %v793_v37 = vrot.slane %v2725_v3, 4  ;;  %v798_v62 = vsel %vm471_vm1, %v778_v40, %v797_v10  ;;  %v3380_v10 = vrot.slane %v3379_v0, 4 }
  0xf2   : > { %v796_v45 = vsel %vm471_vm1, %v795_v35, %v754_v63  ;;  %3373 = vst [vmem:[#allocation7_spill] sm:$0xff] %v2737_v30  ;;  %v1038_v4 = vperm.slane %v1032_v59, %v2314_v42  ;;  %v2016_v51 = vpack.i.bf16 %v798_v62, %v574_v5  ;;  %v1044_v23 = vsel %vm471_vm1, %v1043_v39, %v3374_v25  ;;  %v3376_v63 = vld [vmem:[#allocation10_spill] sm:$0xff]  ;;  %v3378_v35 = vld [vmem:[#allocation11_spill] sm:$0xff] }
  0xf3   : > { %v2006_v58 = vpack.i.bf16 %v796_v45, %v572_v26  ;;  %v794_v44 = vsel %vm471_vm1, %v2737_v30, %v793_v37  ;;  %v3377_v24 = vrot.slane %v3376_v63, 4  ;;  %v1050_v26 = vperm.slane %v1044_v23, %v2314_v42  ;;  %v3381_v39 = vld [vmem:[#allocation15_spill] sm:$0xff]  ;;  %v3382_v45 = vld [vmem:[#allocation17_spill] sm:$0xff] }
  0xf4   : > { %v1996_v53 = vpack.i.bf16 %v794_v44, %v570_v34  ;;  %v1068_v5 = vsel %vm471_vm1, %v3380_v10, %v3378_v35  ;;  %2017 = vrot.lane.b32.xlu0 %v2016_v51, %s2179_s13  ;;  %v1081_v59 = vrot.slane %v1038_v4, 4  ;;  %v3383_v37 = vrot.slane %v3382_v45, 4  ;;  %v3384_v34 = vld [vmem:[#allocation21_spill] sm:$0xff] }
  0xf5   : > { %v1056_v1 = vsel %vm471_vm1, %v3377_v24, %v3375_v16  ;;  %2007 = vrot.lane.b32.xlu1 %v2006_v58, %s2178_s9  ;;  %v1074_v47 = vperm.slane %v1068_v5, %v2314_v42  ;;  %v1267_v62 = vrot.slane %v3384_v34, 4  ;;  %v3385_v24 = vld [vmem:[#allocation22_spill] sm:$0xff]  ;;  %v3389_v5 = vld [vmem:[#allocation20_spill] sm:$0xff] }
  0xf6   : > { %v1062_v40 = vperm.slane %v1056_v1, %v2314_v42  ;;  %v1256_v58 = vsel %vm471_vm1, %v3383_v37, %v3381_v39  ;;  %1997 = vrot.lane.b32.xlu2 %v1996_v53, %s2177_s7  ;;  %v3386_v1 = vld [vmem:[#allocation18_spill] sm:$0xff]  ;;  %v3390_v36 = vrot.slane %v3389_v5, 4  ;;  %v1082_v31 = vsel %vm471_vm1, %v1050_v26, %v1081_v59  ;;  %v3391_v37 = vld [vmem:[#allocation16_spill] sm:$0xff] }
  0xf7   : > { %v1262_v23 = vperm.slane %v1256_v58, %v2314_v42  ;;  %v3387_v10 = vrot.slane %v3386_v1, 4  ;;  %v1268_v30 = vsel %vm471_vm1, %v1267_v62, %v3391_v37  ;;  %v1090_v58 = vperm.slane %v1082_v31, %v2316_v43 }
  0xf8   : > { %v1105_v44 = vrot.slane %v1062_v40, 4  ;;  %v1292_v3 = vsel %vm471_vm1, %v3390_v36, %v3388_v55  ;;  %v1079_v36 = vrot.slane %v1050_v26, 4  ;;  %v1103_v15 = vrot.slane %v1074_v47, 4 }
  0xf9   : > { %v1280_v51 = vsel %vm471_vm1, %v3387_v10, %v3385_v24  ;;  %v1298_v48 = vperm.slane %v1292_v3, %v2314_v42  ;;  %v1274_v10 = vperm.slane %v1268_v30, %v2314_v42  ;;  %v1305_v22 = vrot.slane %v1262_v23, 4 }
  0xfa   : > { %v1286_v53 = vperm.slane %v1280_v51, %v2314_v42  ;;  %v1106_v12 = vsel %vm471_vm1, %v1074_v47, %v1105_v44  ;;  %v1133_v56 = vrot.slane %v1090_v58, 4  ;;  %v1080_v44 = vsel %vm471_vm1, %v1079_v36, %v1038_v4 }
  0xfb   : > { %v1114_v9 = vperm.slane %v1106_v12, %v2316_v43  ;;  %v1306_v59 = vsel %vm471_vm1, %v1274_v10, %v1305_v22  ;;  %v1303_v32 = vrot.slane %v1274_v10, 4  ;;  %v1327_v62 = vrot.slane %v1298_v48, 4 }
  0xfc   : > { %v1329_v33 = vrot.slane %v1286_v53, 4  ;;  %v1314_v3 = vperm.slane %v1306_v59, %v2316_v43  ;;  %v2790_v14 = vperm.slane %v1080_v44, %v2316_v43  ;;  %v1104_v12 = vsel %vm471_vm1, %v1103_v15, %v1062_v40 }
  0xfd   : > { %v1131_v51 = vrot.slane %v1114_v9, 4  ;;  %v1304_v26 = vsel %vm471_vm1, %v1303_v32, %v1262_v23  ;;  %v819_v22 = vrot.slane %v2531_v41, 4  ;;  %v2801_v4 = vperm.slane %v1104_v12, %v2316_v43 }
  0xfe   : > { %v1330_v31 = vsel %vm471_vm1, %v1298_v48, %v1329_v33  ;;  %v2797_v10 = vperm.slane %v1304_v26, %v2316_v43  ;;  %v1328_v33 = vsel %vm471_vm1, %v1327_v62, %v1286_v53  ;;  %v1129_v36 = vrot.slane %v2790_v14, 4 }
  0xff   : > { %v1338_v30 = vperm.slane %v1330_v31, %v2316_v43  ;;  %v1132_v47 = vsel %vm471_vm1, %v1131_v51, %v1090_v58  ;;  %v2805_v59 = vperm.slane %v1328_v33, %v2316_v43  ;;  %v1134_v15 = vsel %vm471_vm1, %v1114_v9, %v1133_v56 }
 0x100   : > { %v1353_v32 = vrot.slane %v2797_v10, 4  ;;  %v1357_v40 = vrot.slane %v1314_v3, 4  ;;  %v3392_v23 = vrot.slane %v2371_v6, 4  ;;  %v843_v53 = vrot.slane %v2559_v21, 4 }
 0x101   : > { %v1355_v48 = vrot.slane %v1338_v30, 4  ;;  %v1130_v51 = vsel %vm471_vm1, %v2801_v4, %v1129_v36  ;;  %v3393_v6 = vrot.slane %v2374_v7, 4  ;;  %v497_v33 = vrot.slane %v2406_v29, 4 }
 0x102   : > { %v474_v58 = vsel %vm471_vm1, %v2391_v18, %v3392_v23  ;;  %v1354_v12 = vsel %vm471_vm1, %v2805_v59, %v1353_v32  ;;  %v1358_v56 = vsel %vm471_vm1, %v1338_v30, %v1357_v40  ;;  %v3395_v30 = vrot.slane %v2437_v2, 4 }
 0x103   : > { %v1356_v62 = vsel %vm471_vm1, %v1355_v48, %v1314_v3  ;;  %v482_v31 = vperm.slane %v474_v58, %v2314_v42  ;;  %v486_v18 = vsel %vm471_vm1, %v2403_v28, %v3393_v6  ;;  %v2011_v9 = vpack.i.bf16 %v1354_v12, %v1130_v51 }
 0x104   : > { %v2021_v44 = vpack.i.bf16 %v1356_v62, %v1132_v47  ;;  %v2031_v26 = vpack.i.bf16 %v1358_v56, %v1134_v15  ;;  %v494_v3 = vperm.slane %v486_v18, %v2314_v42  ;;  %v3394_v47 = vrot.slane %v2394_v19, 4 }
 0x105   : > { %v698_v7 = vsel %vm471_vm1, %v2461_v46, %v3395_v30  ;;  %v3396_v28 = vrot.slane %v3365_v8, 4  ;;  %v721_v32 = vrot.slane %v3362_v38, 4  ;;  %2012 = vrot.lane.b32.xlu2 %v2011_v9, %s2177_s7  ;;  %v498_v19 = vsel %vm471_vm1, %v2397_v20, %v497_v33 }
 0x106   : > { %2022 = vrot.lane.b32.xlu1 %v2021_v44, %s2178_s9  ;;  %v510_v48 = vsel %vm471_vm1, %v2400_v27, %v3394_v47  ;;  %2032 = vrot.lane.b32.xlu0 %v2031_v26, %s2179_s13  ;;  %v531_v2 = vrot.slane %v494_v3, 4  ;;  %v706_v29 = vperm.slane %v698_v7, %v2314_v42  ;;  %v506_v46 = vperm.slane %v498_v19, %v2314_v42 }
 0x107   : > { %v710_v36 = vsel %vm471_vm1, %v2473_v17, %v3396_v28  ;;  %v518_v27 = vperm.slane %v510_v48, %v2314_v42  ;;  %v722_v17 = vsel %vm471_vm1, %v2467_v52, %v721_v32  ;;  %v3397_v38 = vrot.slane %v2464_v49, 4 }
 0x108   : > { %v718_v8 = vperm.slane %v710_v36, %v2314_v42  ;;  %v532_v40 = vsel %vm471_vm1, %v531_v2, %v482_v31  ;;  %v730_v23 = vperm.slane %v722_v17, %v2314_v42  ;;  %v533_v44 = vrot.slane %v482_v31, 4 }
 0x109   : > { %v734_v15 = vsel %vm471_vm1, %v2470_v57, %v3397_v38  ;;  %v555_v20 = vrot.slane %v518_v27, 4  ;;  %v538_v62 = vperm.slane %v532_v40, %v2316_v43  ;;  %v557_v12 = vrot.slane %v506_v46, 4 }
 0x10a   : > { %v742_v58 = vperm.slane %v734_v15, %v2314_v42  ;;  %v755_v51 = vrot.slane %v718_v8, 4  ;;  %v757_v6 = vrot.slane %v706_v29, 4  ;;  %v781_v49 = vrot.slane %v730_v23, 4 }
 0x10b   : > { %v556_v56 = vsel %vm471_vm1, %v555_v20, %v506_v46  ;;  %v577_v57 = vrot.slane %v538_v62, 4  ;;  %v534_v26 = vsel %vm471_vm1, %v494_v3, %v533_v44  ;;  %v558_v31 = vsel %vm471_vm1, %v518_v27, %v557_v12 }
 0x10c   : > { %v779_v52 = vrot.slane %v742_v58, 4  ;;  %v562_v18 = vperm.slane %v556_v56, %v2316_v43  ;;  %v756_v9 = vsel %vm471_vm1, %v755_v51, %v706_v29  ;;  %v2866_v48 = vperm.slane %v534_v26, %v2316_v43 }
 0x10d   : > { %v762_v33 = vperm.slane %v756_v9, %v2316_v43  ;;  %v2872_v36 = vperm.slane %v558_v31, %v2316_v43  ;;  %v758_v3 = vsel %vm471_vm1, %v718_v8, %v757_v6  ;;  %v782_v19 = vsel %vm471_vm1, %v742_v58, %v781_v49 }
 0x10e   : > { %v780_v47 = vsel %vm471_vm1, %v779_v52, %v730_v23  ;;  %v578_v30 = vsel %vm471_vm1, %v562_v18, %v577_v57  ;;  %v575_v28 = vrot.slane %v562_v18, 4  ;;  %v3398_v2 = vrot.slane %v3369_v54, 4 }
 0x10f   : > { %v786_v7 = vperm.slane %v780_v47, %v2316_v43  ;;  %v801_v32 = vrot.slane %v762_v33, 4  ;;  %v579_v17 = vrot.slane %v2872_v36, 4  ;;  %v2883_v38 = vperm.slane %v758_v3, %v2316_v43 }
 0x110   : > { %v1034_v29 = vsel %vm471_vm1, %v3370_v13, %v3398_v2  ;;  %v576_v27 = vsel %vm471_vm1, %v575_v28, %v538_v62  ;;  %v2887_v40 = vperm.slane %v782_v19, %v2316_v43  ;;  %v3399_v54 = vrot.slane %v3374_v25, 4 }
 0x111   : > { %v799_v46 = vrot.slane %v786_v7, 4  ;;  %v802_v15 = vsel %vm471_vm1, %v786_v7, %v801_v32  ;;  %v1042_v8 = vperm.slane %v1034_v29, %v2314_v42  ;;  %v580_v58 = vsel %vm471_vm1, %v579_v17, %v2866_v48 }
 0x112   : > { %v1046_v13 = vsel %vm471_vm1, %v3372_v11, %v3399_v54  ;;  %v2036_v20 = vpack.i.bf16 %v802_v15, %v578_v30  ;;  %v803_v44 = vrot.slane %v2887_v40, 4  ;;  %v1057_v12 = vrot.slane %v3375_v16, 4 }
 0x113   : > { %v800_v23 = vsel %vm471_vm1, %v799_v46, %v762_v33  ;;  %v1054_v62 = vperm.slane %v1046_v13, %v2314_v42  ;;  %v3400_v56 = vrot.slane %v3378_v35, 4  ;;  %v3401_v6 = vrot.slane %v3381_v39, 4 }
 0x114   : > { %v2026_v51 = vpack.i.bf16 %v800_v23, %v576_v27  ;;  %2037 = vrot.lane.b32.xlu1 %v2036_v20, %s2180_s15  ;;  %v3402_v18 = vrot.slane %v3391_v37, 4  ;;  %v804_v35 = vsel %vm471_vm1, %v803_v44, %v2883_v38  ;;  %v1281_v33 = vrot.slane %v3385_v24, 4 }
 0x115   : > { %v1070_v25 = vsel %vm471_vm1, %v3379_v0, %v3400_v56  ;;  %v1091_v52 = vrot.slane %v1054_v62, 4  ;;  %v1258_v49 = vsel %vm471_vm1, %v3382_v45, %v3401_v6  ;;  %v1058_v0 = vsel %vm471_vm1, %v3376_v63, %v1057_v12 }
 0x116   : > { %v1078_v11 = vperm.slane %v1070_v25, %v2314_v42  ;;  %v1270_v16 = vsel %vm471_vm1, %v3384_v34, %v3402_v18  ;;  %2027 = vrot.lane.b32.xlu2 %v2026_v51, %s2181_s16  ;;  %v1266_v57 = vperm.slane %v1258_v49, %v2314_v42  ;;  %v2046_v9 = vpack.i.bf16 %v804_v35, %v580_v58  ;;  %v3404_v25 = vld [vmem:[#allocation28_spill] sm:$0xff] }
 0x117   : > { %v1278_v39 = vperm.slane %v1270_v16, %v2314_v42  ;;  %v1066_v45 = vperm.slane %v1058_v0, %v2314_v42  ;;  %v1092_v37 = vsel %vm471_vm1, %v1091_v52, %v1042_v8  ;;  %v3403_v47 = vrot.slane %v3388_v55, 4 }
 0x118   : > { %v1115_v26 = vrot.slane %v1078_v11, 4  ;;  %v1098_v34 = vperm.slane %v1092_v37, %v2316_v43  ;;  %2047 = vrot.lane.b32.xlu0 %v2046_v9, %s2182_s17  ;;  %v1093_v28 = vrot.slane %v1042_v8, 4  ;;  %v1282_v24 = vsel %vm471_vm1, %v3386_v1, %v1281_v33 }
 0x119   : > { %v1294_v31 = vsel %vm471_vm1, %v3389_v5, %v3403_v47  ;;  %v1315_v63 = vrot.slane %v1278_v39, 4  ;;  %v1117_v32 = vrot.slane %v1066_v45, 4  ;;  %v1290_v2 = vperm.slane %v1282_v24, %v2314_v42  ;;  %v3414_v24 = vld [vmem:[#allocation31_spill] sm:$0xff] }
 0x11a   : > { %v1116_v30 = vsel %vm471_vm1, %v1115_v26, %v1066_v45  ;;  %v1302_v7 = vperm.slane %v1294_v31, %v2314_v42  ;;  %v1137_v19 = vrot.slane %v1098_v34, 4  ;;  %v1094_v27 = vsel %vm471_vm1, %v1054_v62, %v1093_v28  ;;  %v3411_v28 = vld [vmem:[#allocation30_spill] sm:$0xff] }
 0x11b   : > { %v1122_v3 = vperm.slane %v1116_v30, %v2316_v43  ;;  %v1316_v55 = vsel %vm471_vm1, %v1315_v63, %v1266_v57  ;;  %v2941_v15 = vperm.slane %v1094_v27, %v2316_v43  ;;  %v1118_v8 = vsel %vm471_vm1, %v1078_v11, %v1117_v32  ;;  %v3408_v63 = vld [vmem:[#allocation26_spill] sm:$0xff]  ;;  %v3409_v30 = vld [vmem:[#allocation27_spill] sm:$0xff]  ;;  %v3412_v32 = vld [vmem:[#allocation32_spill] sm:$0xff] }
 0x11c   : > { %v1322_v5 = vperm.slane %v1316_v55, %v2316_v43  ;;  %v1339_v29 = vrot.slane %v1302_v7, 4  ;;  %v1126_v13 = vperm.slane %v1118_v8, %v2316_v43  ;;  %v1317_v20 = vrot.slane %v1266_v57, 4 }
 0x11d   : > { %v1138_v46 = vsel %vm471_vm1, %v1122_v3, %v1137_v19  ;;  %v1135_v17 = vrot.slane %v1122_v3, 4  ;;  %v1341_v51 = vrot.slane %v1290_v2, 4  ;;  %v581_v62 = vrot.slane %v2866_v48, 4 }
 0x11e   : > { %v1340_v54 = vsel %vm471_vm1, %v1339_v29, %v1290_v2  ;;  %v1361_v1 = vrot.slane %v1322_v5, 4  ;;  %v1139_v44 = vrot.slane %v1126_v13, 4  ;;  %v1318_v12 = vsel %vm471_vm1, %v1278_v39, %v1317_v20 }
 0x11f   : > { %v1346_v23 = vperm.slane %v1340_v54, %v2316_v43  ;;  %v1136_v58 = vsel %vm471_vm1, %v1135_v17, %v1098_v34  ;;  %v805_v56 = vrot.slane %v2883_v38, 4  ;;  %v3405_v11 = vrot.slane %v2484_v60, 4  ;;  %v3415_v17 = vld [vmem:[#allocation25_spill] sm:$0xff] }
 0x120   : > { %v1326_v18 = vperm.slane %v1318_v12, %v2316_v43  ;;  %v1342_v16 = vsel %vm471_vm1, %v1302_v7, %v1341_v51  ;;  %v1140_v48 = vsel %vm471_vm1, %v1139_v44, %v2941_v15  ;;  %v582_v38 = vsel %vm471_vm1, %v2872_v36, %v581_v62  ;;  %v3407_v36 = vld [vmem:[#allocation29_spill] sm:$0xff]  ;;  %v3417_v51 = vld [vmem:[#allocation34_spill] sm:$0xff] }
 0x121   : > { %v584_v52 = vsel %vm471_vm1, %v3405_v11, %v3404_v25  ;;  %v1362_v6 = vsel %vm471_vm1, %v1346_v23, %v1361_v1  ;;  %v1359_v49 = vrot.slane %v1346_v23, 4  ;;  %v1350_v0 = vperm.slane %v1342_v16, %v2316_v43  ;;  %v3416_v1 = vld [vmem:[#allocation36_spill] sm:$0xff]  ;;  %v3418_v12 = vld [vmem:[#allocation33_spill] sm:$0xff] }
 0x122   : > { %v2051_v35 = vpack.i.bf16 %v1362_v6, %v1138_v46  ;;  %v806_v39 = vsel %vm471_vm1, %v2887_v40, %v805_v56  ;;  %v590_v9 = vperm.slane %v584_v52, %v2314_v42  ;;  %v3406_v45 = vrot.slane %v2487_v50, 4 }
 0x123   : > { %v1360_v57 = vsel %vm471_vm1, %v1359_v49, %v1322_v5  ;;  %v1363_v34 = vrot.slane %v1350_v0, 4  ;;  %v2056_v33 = vpack.i.bf16 %v806_v39, %v582_v38  ;;  %v607_v31 = vrot.slane %v3407_v36, 4 }
 0x124   : > { %v596_v37 = vsel %vm471_vm1, %v3406_v45, %v2481_v61  ;;  %2052 = vrot.lane.b32.xlu1 %v2051_v35, %s2180_s15  ;;  %v2041_v26 = vpack.i.bf16 %v1360_v57, %v1136_v58  ;;  %v3410_v7 = vrot.slane %v3409_v30, 4  ;;  %v3413_v3 = vrot.slane %v3412_v32, 4 }
 0x125   : > { %v602_v47 = vperm.slane %v596_v37, %v2314_v42  ;;  %v820_v55 = vsel %vm471_vm1, %v819_v22, %v3414_v24  ;;  %v1364_v2 = vsel %vm471_vm1, %v1363_v34, %v1326_v18  ;;  %v608_v8 = vsel %vm471_vm1, %v607_v31, %v3415_v17 }
 0x126   : > { %v620_v40 = vsel %vm471_vm1, %v3410_v7, %v3408_v63  ;;  %v808_v19 = vsel %vm471_vm1, %v3413_v3, %v3411_v28  ;;  %2042 = vrot.lane.b32.xlu2 %v2041_v26, %s2181_s16  ;;  %v2061_v46 = vpack.i.bf16 %v1364_v2, %v1140_v48  ;;  %v826_v54 = vperm.slane %v820_v55, %v2314_v42 }
 0x127   : > { %v626_v5 = vperm.slane %v620_v40, %v2314_v42  ;;  %v631_v29 = vrot.slane %v602_v47, 4  ;;  %v814_v27 = vperm.slane %v808_v19, %v2314_v42  ;;  %v831_v20 = vrot.slane %v3416_v1, 4 }
 0x128   : > { %v614_v23 = vperm.slane %v608_v8, %v2314_v42  ;;  %v844_v62 = vsel %vm471_vm1, %v843_v53, %v3417_v51  ;;  %2062 = vrot.lane.b32.xlu0 %v2061_v46, %s2182_s17  ;;  %v855_v52 = vrot.slane %v826_v54, 4  ;;  %v1141_v16 = vrot.slane %v2941_v15, 4 }
 0x129   : > { %v632_v22 = vsel %vm471_vm1, %v631_v29, %v590_v9  ;;  %v655_v58 = vrot.slane %v626_v5, 4  ;;  %v832_v56 = vsel %vm471_vm1, %v831_v20, %v3418_v12  ;;  %v850_v11 = vperm.slane %v844_v62, %v2314_v42 }
 0x12a   : > { %v3002_v44 = vperm.slane %v632_v22, %v2316_v43  ;;  %v838_v49 = vperm.slane %v832_v56, %v2314_v42  ;;  %v1365_v35 = vrot.slane %v1326_v18, 4  ;;  %v856_v38 = vsel %vm471_vm1, %v855_v52, %v814_v27 }
 0x12b   : > { %v656_v6 = vsel %vm471_vm1, %v655_v58, %v614_v23  ;;  %v879_v57 = vrot.slane %v850_v11, 4  ;;  %v3016_v39 = vperm.slane %v856_v38, %v2316_v43  ;;  %v1142_v45 = vsel %vm471_vm1, %v1126_v13, %v1141_v16 }
 0x12c   : > { %v3011_v53 = vperm.slane %v656_v6, %v2316_v43  ;;  %v681_v48 = vrot.slane %v3002_v44, 4  ;;  %v1366_v37 = vsel %vm471_vm1, %v1350_v0, %v1365_v35  ;;  %v633_v26 = vrot.slane %v590_v9, 4  ;;  %v325_v0 = vld [vmem:[%s2270_s8 + $0x78] sm:$0xff]  ;;  %v324_v9 = vld [vmem:[%s2270_s8 + $0x70] sm:$0xff] }
 0x12d   : > { %v833_v15 = vrot.slane %v3418_v12, 4  ;;  %v880_v34 = vsel %vm471_vm1, %v879_v57, %v838_v49  ;;  %v2071_v31 = vpack.i.bf16 %v1366_v37, %v1142_v45  ;;  %v905_v40 = vrot.slane %v3016_v39, 4  ;;  %1864 = vmatpush.msra.mxu2 %v325_v0  ;;  %1865 = vmatpush.msra.mxu3 %v325_v0 }
 0x12e   : > { %v682_v18 = vsel %vm471_vm1, %v3011_v53, %v681_v48  ;;  %2057 = vrot.lane.b32.xlu2 %v2056_v33, %s2183_s19  ;;  %v3026_v7 = vperm.slane %v880_v34, %v2316_v43  ;;  %v634_v13 = vsel %vm471_vm1, %v602_v47, %v633_v26  ;;  %v657_v3 = vrot.slane %v614_v23, 4  ;;  %1662 = vmatpush.msra.mxu0 %v325_v0 }
 0x12f   : > { %v642_v19 = vperm.slane %v634_v13, %v2316_v43  ;;  %v857_v55 = vrot.slane %v814_v27, 4  ;;  %v881_v2 = vrot.slane %v838_v49, 4  ;;  %v585_v29 = vrot.slane %v3404_v25, 4  ;;  %1863 = vmatpush.msra.mxu1 %v325_v0  ;;  %1867 = vmatpush.msra.mxu2 %v324_v9 }
 0x130   : > { %v845_v33 = vrot.slane %v3417_v51, 4  ;;  %v906_v46 = vsel %vm471_vm1, %v3026_v7, %v905_v40  ;;  %v658_v8 = vsel %vm471_vm1, %v626_v5, %v657_v3  ;;  %v3419_v47 = vrot.slane %v2481_v61, 4  ;;  %1868 = vmatpush.msra.mxu3 %v324_v9  ;;  %1663 = vmatpush.msra.mxu0 %v324_v9  ;;  %v323_v3 = vld [vmem:[%s2270_s8 + $0x68] sm:$0xff] }
 0x131   : > { %v2066_v27 = vpack.i.bf16 %v906_v46, %v682_v18  ;;  %v666_v23 = vperm.slane %v658_v8, %v2316_v43  ;;  %v858_v25 = vsel %vm471_vm1, %v826_v54, %v857_v55  ;;  %v882_v22 = vsel %vm471_vm1, %v850_v11, %v881_v2  ;;  %1866 = vmatpush.msra.mxu1 %v324_v9  ;;  %v321_v46 = vld [vmem:[%s2270_s8 + $0x58] sm:$0xff] }
 0x132   : > { %v598_v20 = vsel %vm471_vm1, %v2487_v50, %v3419_v47  ;;  %v866_v58 = vperm.slane %v858_v25, %v2316_v43  ;;  %v890_v51 = vperm.slane %v882_v22, %v2316_v43  ;;  %v685_v5 = vrot.slane %v642_v19, 4  ;;  %1870 = vmatpush.msra.mxu2 %v323_v3  ;;  %1871 = vmatpush.msra.mxu3 %v323_v3 }
 0x133   : > { %v586_v61 = vsel %vm471_vm1, %v2484_v60, %v585_v29  ;;  %2067 = vrot.lane.b32.xlu1 %v2066_v27, %s2177_s7  ;;  %v683_v50 = vrot.slane %v666_v23, 4  ;;  %v606_v54 = vperm.slane %v598_v20, %v2314_v42  ;;  %v3420_v56 = vrot.slane %v3415_v17, 4  ;;  %1664 = vmatpush.msra.mxu0 %v323_v3  ;;  %v320_v20 = vld [vmem:[%s2270_s8 + $0x50] sm:$0xff] }
 0x134   : > { %v594_v62 = vperm.slane %v586_v61, %v2314_v42  ;;  %v907_v52 = vrot.slane %v890_v51, 4  ;;  %v686_v6 = vsel %vm471_vm1, %v666_v23, %v685_v5  ;;  %v909_v49 = vrot.slane %v866_v58, 4  ;;  %1869 = vmatpush.msra.mxu1 %v323_v3  ;;  %v313_v3 = vld [vmem:[%s2270_s8 + $0x18] sm:$0xff] }
 0x135   : > { %v610_v11 = vsel %vm471_vm1, %v3407_v36, %v3420_v56  ;;  %v684_v16 = vsel %vm471_vm1, %v683_v50, %v642_v19  ;;  %v3421_v35 = vrot.slane %v3408_v63, 4  ;;  %v643_v38 = vrot.slane %v606_v54, 4 }
 0x136   : > { %v618_v60 = vperm.slane %v610_v11, %v2314_v42  ;;  %v809_v17 = vrot.slane %v3411_v28, 4  ;;  %2072 = vrot.lane.b32.xlu2 %v2071_v31, %s2183_s19  ;;  %v908_v36 = vsel %vm471_vm1, %v907_v52, %v866_v58  ;;  %v910_v57 = vsel %vm471_vm1, %v890_v51, %v909_v49 }
 0x137   : > { %v622_v48 = vsel %vm471_vm1, %v3409_v30, %v3421_v35  ;;  %v3422_v37 = vrot.slane %v3414_v24, 4  ;;  %v2076_v26 = vpack.i.bf16 %v908_v36, %v684_v16  ;;  %v2081_v30 = vpack.i.bf16 %v910_v57, %v686_v6  ;;  %v322_v24 = vld [vmem:[%s2270_s8 + $0x60] sm:$0xff] }
 0x138   : > { %v630_v45 = vperm.slane %v622_v48, %v2314_v42  ;;  %v644_v18 = vsel %vm471_vm1, %v643_v38, %v594_v62  ;;  %v810_v28 = vsel %vm471_vm1, %v3412_v32, %v809_v17  ;;  %v846_v32 = vsel %vm471_vm1, %v2559_v21, %v845_v33  ;;  %1873 = vmatpush.msra.mxu2 %v322_v24 }
 0x139   : > { %v822_v63 = vsel %vm471_vm1, %v2531_v41, %v3422_v37  ;;  %v650_v34 = vperm.slane %v644_v18, %v2316_v43  ;;  %v818_v40 = vperm.slane %v810_v28, %v2314_v42  ;;  %2077 = vrot.lane.b32.xlu0 %v2076_v26, %s2178_s9  ;;  %v834_v41 = vsel %vm471_vm1, %v3416_v1, %v833_v15  ;;  %v318_v18 = vld [vmem:[%s2270_s8 + $0x40] sm:$0xff] }
 0x13a   : > { %v667_v31 = vrot.slane %v630_v45, 4  ;;  %v830_v13 = vperm.slane %v822_v63, %v2314_v42  ;;  %v645_v0 = vrot.slane %v594_v62, 4  ;;  %v669_v9 = vrot.slane %v618_v60, 4  ;;  %1874 = vmatpush.msra.mxu3 %v322_v24  ;;  %1876 = vmatpush.msra.mxu2 %v321_v46 }
 0x13b   : > { %v842_v55 = vperm.slane %v834_v41, %v2314_v42  ;;  %v854_v2 = vperm.slane %v846_v32, %v2314_v42  ;;  %2082 = vrot.lane.b32.xlu1 %v2081_v30, %s2179_s13  ;;  %v689_v12 = vrot.slane %v650_v34, 4  ;;  %v869_v22 = vrot.slane %v818_v40, 4  ;;  %1665 = vmatpush.msra.mxu0 %v322_v24  ;;  %v3424_v32 = vld [vmem:[#allocation39_spill] sm:$0xff] }
 0x13c   : > { %v668_v19 = vsel %vm471_vm1, %v667_v31, %v618_v60  ;;  %v867_v29 = vrot.slane %v830_v13, 4  ;;  %v646_v21 = vsel %vm471_vm1, %v606_v54, %v645_v0  ;;  %v670_v15 = vsel %vm471_vm1, %v630_v45, %v669_v9  ;;  %1877 = vmatpush.msra.mxu3 %v321_v46  ;;  %1872 = vmatpush.msra.mxu1 %v322_v24  ;;  %v316_v31 = vld [vmem:[%s2270_s8 + $0x30] sm:$0xff] }
 0x13d   : > { %v674_v1 = vperm.slane %v668_v19, %v2316_v43  ;;  %v891_v8 = vrot.slane %v854_v2, 4  ;;  %v654_v42 = vperm.slane %v646_v21, %v2316_v43  ;;  %v678_v47 = vperm.slane %v670_v15, %v2316_v43  ;;  %1879 = vmatpush.msra.mxu2 %v320_v20  ;;  %1666 = vmatpush.msra.mxu0 %v321_v46  ;;  %v3423_v24 = vld [vmem:[#allocation37_spill] sm:$0xff]  ;;  %v3426_v15 = vld [vmem:[#allocation38_spill] sm:$0xff] }
 0x13e   : > { %v868_v33 = vsel %vm471_vm1, %v867_v29, %v818_v40  ;;  %v893_v5 = vrot.slane %v842_v55, 4  ;;  %v870_v56 = vsel %vm471_vm1, %v830_v13, %v869_v22  ;;  %1880 = vmatpush.msra.mxu3 %v320_v20  ;;  %1875 = vmatpush.msra.mxu1 %v321_v46  ;;  %v679_v17 = vrot.slane %v3011_v53, 4  ;;  %v319_v53 = vld [vmem:[%s2270_s8 + $0x48] sm:$0xff]  ;;  %v314_v13 = vld [vmem:[%s2270_s8 + $0x20] sm:$0xff]  ;;  %v312_v19 = vld [vmem:[%s2270_s8 + $0x10] sm:$0xff] }
 0x13f   : > { %v687_v27 = vrot.slane %v674_v1, 4  ;;  %v874_v23 = vperm.slane %v868_v33, %v2316_v43  ;;  %v690_v25 = vsel %vm471_vm1, %v674_v1, %v689_v12  ;;  %v892_v58 = vsel %vm471_vm1, %v891_v8, %v842_v55  ;;  %1667 = vmatpush.msra.mxu0 %v320_v20  ;;  %1882 = vmatpush.msra.mxu2 %v319_v53  ;;  %v315_v40 = vld [vmem:[%s2270_s8 + $0x28] sm:$0xff]  ;;  %v3425_v12 = vld [vmem:[#allocation35_spill] sm:$0xff] }
 0x140   : > { %v691_v51 = vrot.slane %v678_v47, 4  ;;  %v693_v61 = vrot.slane %v654_v42, 4  ;;  %v898_v62 = vperm.slane %v892_v58, %v2316_v43  ;;  %v878_v52 = vperm.slane %v870_v56, %v2316_v43  ;;  %1878 = vmatpush.msra.mxu1 %v320_v20  ;;  %1883 = vmatpush.msra.mxu3 %v319_v53 }
 0x141   : > { %v688_v50 = vsel %vm471_vm1, %v687_v27, %v650_v34  ;;  %v913_v54 = vrot.slane %v874_v23, 4  ;;  %v894_v6 = vsel %vm471_vm1, %v854_v2, %v893_v5  ;;  %v903_v45 = vrot.slane %v3026_v7, 4  ;;  %v317_v7 = vld [vmem:[%s2270_s8 + $0x38] sm:$0xff]  ;;  %1668 = vmatpush.msra.mxu0 %v319_v53  ;;  %1885 = vmatpush.msra.mxu2 %v318_v18 }
 0x142   : > { %v692_v11 = vsel %vm471_vm1, %v691_v51, %v654_v42  ;;  %v694_v49 = vsel %vm471_vm1, %v678_v47, %v693_v61  ;;  %v911_v60 = vrot.slane %v898_v62, 4  ;;  %v902_v35 = vperm.slane %v894_v6, %v2316_v43  ;;  %1886 = vmatpush.msra.mxu3 %v318_v18  ;;  %1881 = vmatpush.msra.mxu1 %v319_v53 }
 0x143   : > { %v914_v16 = vsel %vm471_vm1, %v898_v62, %v913_v54  ;;  %v917_v38 = vrot.slane %v878_v52, 4  ;;  %v3122_v28 = vsel %vm471_vm1, %v679_v17, %v3002_v44  ;;  %v3128_v34 = vsel %vm471_vm1, %v903_v45, %v3016_v39  ;;  %1669 = vmatpush.msra.mxu0 %v318_v18  ;;  %1888 = vmatpush.msra.mxu2 %v317_v7  ;;  %v1968_v44 = vpop.permute.xlu2 %1967 }
 0x144   : > { %v2091_v48 = vpack.i.bf16 %v914_v16, %v690_v25  ;;  %v912_v36 = vsel %vm471_vm1, %v911_v60, %v874_v23  ;;  %v915_v57 = vrot.slane %v902_v35, 4  ;;  %1889 = vmatpush.msra.mxu3 %v317_v7  ;;  %1884 = vmatpush.msra.mxu1 %v318_v18  ;;  %v1015_v41 = vrot.slane %v3423_v24, 4 }
 0x145   : > { %v2086_v37 = vpack.i.bf16 %v912_v36, %v688_v50  ;;  %v918_v43 = vsel %vm471_vm1, %v902_v35, %v917_v38  ;;  %1670 = vmatpush.msra.mxu0 %v317_v7  ;;  %1891 = vmatpush.msra.mxu2 %v316_v31  ;;  %v1239_v0 = vrot.slane %v3424_v32, 4  ;;  %v1970_v55 = vunpack.i.h.bf16 %v1968_v44 }
 0x146   : > { %2092 = vrot.lane.b32.xlu0 %v2091_v48, %s2180_s15  ;;  %v916_v63 = vsel %vm471_vm1, %v915_v57, %v878_v52  ;;  %v2101_v26 = vpack.i.bf16 %v918_v43, %v694_v49  ;;  %1892 = vmatpush.msra.mxu3 %v316_v31  ;;  %v1969_v2 = vunpack.i.l.bf16 %v1968_v44  ;;  %v1016_v21 = vsel %vm471_vm1, %v1015_v41, %v3425_v12  ;;  %v310_v52 = vld [vmem:[%s2270_s8] sm:$0xff] }
 0x147   : > { %2087 = vrot.lane.b32.xlu2 %v2086_v37, %s2181_s16  ;;  %v2096_v30 = vpack.i.bf16 %v916_v63, %v692_v11  ;;  %1887 = vmatpush.msra.mxu1 %v317_v7  ;;  %v1973_v39 = vpop.permute.xlu0 %1972  ;;  %v1240_v33 = vsel %vm471_vm1, %v1239_v0, %v3426_v15  ;;  %v311_v11 = vld [vmem:[%s2270_s8 + $0x8] sm:$0xff] }
 0x148   : > { %1671 = vmatpush.msra.mxu0 %v316_v31  ;;  %1894 = vmatpush.msra.mxu2 %v315_v40  ;;  %v1975_v29 = vunpack.i.h.bf16 %v1973_v39  ;;  %v1974_v46 = vunpack.i.l.bf16 %v1973_v39  ;;  %v1596_v8 = vsel %vm1591_vm2, %v1016_v21, %v1969_v2  ;;  %v1598_v42 = vsel %vm1591_vm2, %v1240_v33, %v1970_v55  ;;  %v3428_v39 = vld [vmem:[#allocation7_spill] sm:$0xff]  ;;  %v3430_v55 = vld [vmem:[#allocation40_spill] sm:$0xff] }
 0x149   : > { %2097 = vrot.lane.b32.xlu1 %v2096_v30, %s2182_s17  ;;  %1890 = vmatpush.msra.mxu1 %v316_v31  ;;  %v1978_v9 = vpop.permute.xlu1 %1977  ;;  %v3427_v31 = vld [vmem:[#allocation23_spill] sm:$0xff] }
 0x14a   : > { %1895 = vmatpush.msra.mxu3 %v315_v40  ;;  %1672 = vmatpush.msra.mxu0 %v315_v40  ;;  %v1980_v47 = vunpack.i.h.bf16 %v1978_v9  ;;  %v1979_v20 = vunpack.i.l.bf16 %v1978_v9  ;;  %v1607_v23 = vsel %vm1600_vm3, %v1598_v42, %v1975_v29  ;;  %v1605_v25 = vsel %vm1600_vm3, %v1596_v8, %v1974_v46  ;;  %v3429_v9 = vld [vmem:[#allocation24_spill] sm:$0xff] }
 0x14b   : > { %1893 = vmatpush.msra.mxu1 %v315_v40  ;;  %1897 = vmatpush.msra.mxu2 %v314_v13  ;;  %v1983_v1 = vpop.permute.xlu2 %1982  ;;  %v567_v44 = vrot.slane %v3427_v31, 4  ;;  %v791_v40 = vrot.slane %v3428_v39, 4 }
 0x14c   : > { %1898 = vmatpush.msra.mxu3 %v314_v13  ;;  %1673 = vmatpush.msra.mxu0 %v314_v13  ;;  %v1616_v22 = vsel %vm1609_vm4, %v1607_v23, %v1980_v47  ;;  %v1614_v58 = vsel %vm1609_vm4, %v1605_v25, %v1979_v20  ;;  %v1985_v61 = vunpack.i.h.bf16 %v1983_v1  ;;  %v1984_v50 = vunpack.i.l.bf16 %v1983_v1 }
 0x14d   : > { %1896 = vmatpush.msra.mxu1 %v314_v13  ;;  %1900 = vmatpush.msra.mxu2 %v313_v3  ;;  %v792_v2 = vsel %vm471_vm1, %v791_v40, %v3430_v55 }
 0x14e   : > { %1901 = vmatpush.msra.mxu3 %v313_v3  ;;  %1674 = vmatpush.msra.mxu0 %v313_v3  ;;  %v1623_v6 = vsel %vm1618_vm5, %v1614_v58, %v1984_v50  ;;  %v1625_v49 = vsel %vm1618_vm5, %v1616_v22, %v1985_v61 }
 0x14f   : > { %2102 = vrot.lane.b32.xlu2 %v2101_v26, %s2183_s19  ;;  %1899 = vmatpush.msra.mxu1 %v313_v3 }
 0x150   : > { %1903 = vmatpush.msra.mxu2 %v312_v19  ;;  %1904 = vmatpush.msra.mxu3 %v312_v19 }
 0x151   : > { %1675 = vmatpush.msra.mxu0 %v312_v19  ;;  %1902 = vmatpush.msra.mxu1 %v312_v19  ;;  %v568_v19 = vsel %vm471_vm1, %v567_v44, %v3429_v9 }
 0x152   : > { %1906 = vmatpush.msra.mxu2 %v311_v11  ;;  %1907 = vmatpush.msra.mxu3 %v311_v11 }
 0x153   : > { %v1998_v60 = vpop.permute.xlu2 %1997  ;;  %1676 = vmatpush.msra.mxu0 %v311_v11  ;;  %1905 = vmatpush.msra.mxu1 %v311_v11 }
 0x154   : > { %1909 = vmatpush.msra.mxu2 %v310_v52  ;;  %1910 = vmatpush.msra.mxu3 %v310_v52  ;;  %v2000_v13 = vunpack.i.h.bf16 %v1998_v60  ;;  %v1999_v3 = vunpack.i.l.bf16 %v1998_v60 }
 0x155   : > { %v1988_v27 = vpop.permute.xlu0 %1987  ;;  %1677 = vmatpush.msra.mxu0 %v310_v52  ;;  %1908 = vmatpush.msra.mxu1 %v310_v52 }
 0x156   : > { %v1990_v51 = vunpack.i.h.bf16 %v1988_v27  ;;  %v1989_v5 = vunpack.i.l.bf16 %v1988_v27  ;;  %v1592_v29 = vsel %vm1591_vm2, %v568_v19, %v1999_v3  ;;  %v1594_v46 = vsel %vm1591_vm2, %v792_v2, %v2000_v13 }
 0x158   : > { %v1632_v35 = vsel %vm1627_vm6, %v1623_v6, %v1989_v5  ;;  %v1634_v48 = vsel %vm1627_vm6, %v1625_v49, %v1990_v51  ;;  %v1127_v6 = vrot.slane %v2801_v4, 4  ;;  %v1351_v49 = vrot.slane %v2805_v59, 4 }
 0x15a   : > { %v1993_v62 = vpop.permute.xlu1 %1992 }
 0x15b   : > { %v1995_v54 = vunpack.i.h.bf16 %v1993_v62  ;;  %v1994_v56 = vunpack.i.l.bf16 %v1993_v62 }
 0x15d   : > { %v2003_v16 = vpop.permute.xlu0 %2002  ;;  %v1641_v36 = vsel %vm1636_vm7, %v1632_v35, %v1994_v56  ;;  %v1643_v57 = vsel %vm1636_vm7, %v1634_v48, %v1995_v54 }
 0x15e   : > { %v2005_v38 = vunpack.i.h.bf16 %v2003_v16  ;;  %v2004_v17 = vunpack.i.l.bf16 %v2003_v16 }
 0x15f   : > { %v2013_v43 = vpop.permute.xlu2 %2012 }
 0x160   : > { %v1650_v45 = vsel %vm1645_vm8, %v1641_v36, %v2004_v17  ;;  %v1652_v37 = vsel %vm1645_vm8, %v1643_v57, %v2005_v38  ;;  %v2015_v60 = vunpack.i.h.bf16 %v2013_v43  ;;  %v2014_v16 = vunpack.i.l.bf16 %v2013_v43 }
 0x161   : > { %1690 = vmatmul.f32.vlgmr.msra.gmra.mxu2 %v1650_v45  ;;  %1696 = vmatmul.f32.vlgmr.msra.gmra.mxu3 %v1652_v37  ;;  %v1128_v36 = vsel %vm471_vm1, %v1127_v6, %v2790_v14  ;;  %v1352_v57 = vsel %vm471_vm1, %v1351_v49, %v2797_v10 }
 0x162   : > { %v1599_v37 = vsel %vm1591_vm2, %v1352_v57, %v2015_v60 }
 0x166   : > { %v2018_v30 = vpop.permute.xlu0 %2017 }
 0x167   : > { %v2008_v63 = vpop.permute.xlu1 %2007  ;;  %v2020_v32 = vunpack.i.h.bf16 %v2018_v30  ;;  %v2019_v0 = vunpack.i.l.bf16 %v2018_v30 }
 0x168   : > { %v2010_v24 = vunpack.i.h.bf16 %v2008_v63  ;;  %v2009_v41 = vunpack.i.l.bf16 %v2008_v63  ;;  %v1597_v63 = vsel %vm1591_vm2, %v1128_v36, %v2014_v16 }
 0x16a   : > { %v1603_v12 = vsel %vm1600_vm3, %v1594_v46, %v2010_v24  ;;  %v1601_v21 = vsel %vm1600_vm3, %v1592_v29, %v2009_v41 }
 0x16b   : > { %v1610_v15 = vsel %vm1609_vm4, %v1601_v21, %v2019_v0  ;;  %v1612_v33 = vsel %vm1609_vm4, %v1603_v12, %v2020_v32 }
 0x170   : > { %v2028_v26 = vpop.permute.xlu2 %2027 }
 0x171   : > { %v2030_v47 = vunpack.i.h.bf16 %v2028_v26  ;;  %v2029_v20 = vunpack.i.l.bf16 %v2028_v26 }
 0x173   : > { %v1619_v58 = vsel %vm1618_vm5, %v1610_v15, %v2029_v20  ;;  %v1621_v51 = vsel %vm1618_vm5, %v1612_v33, %v2030_v47 }
 0x178   : > { %v2023_v53 = vpop.permute.xlu1 %2022  ;;  %v2033_v7 = vpop.permute.xlu0 %2032 }
 0x179   : > { %v2025_v35 = vunpack.i.h.bf16 %v2023_v53  ;;  %v2024_v48 = vunpack.i.l.bf16 %v2023_v53  ;;  %v2035_v38 = vunpack.i.h.bf16 %v2033_v7  ;;  %v2034_v17 = vunpack.i.l.bf16 %v2033_v7 }
 0x17b   : > { %v1608_v4 = vsel %vm1600_vm3, %v1599_v37, %v2025_v35  ;;  %v1606_v59 = vsel %vm1600_vm3, %v1597_v63, %v2024_v48  ;;  %v1654_v63 = vld [vmem:[#allocation2] sm:$0xff] }
 0x17c   : > { %v1615_v43 = vsel %vm1609_vm4, %v1606_v59, %v2034_v17  ;;  %v1617_v26 = vsel %vm1609_vm4, %v1608_v4, %v2035_v38  ;;  %v1658_v38 = vld [vmem:[#allocation2 + $0x20] sm:$0xff]  ;;  %v1660_v17 = vld [vmem:[#allocation2 + $0x30] sm:$0xff] }
 0x17d   : > { %v1656_v4 = vld [vmem:[#allocation2 + $0x10] sm:$0xff] }
 0x180   : > { %v3158_v18 = vpop.permute.xlu2 %2042 }
 0x181   : > { %v2045_v14 = vunpack.i.h.bf16 %v3158_v18  ;;  %v2044_v7 = vunpack.i.l.bf16 %v3158_v18 }
 0x183   : > { %v1624_v40 = vsel %vm1618_vm5, %v1615_v43, %v2044_v7  ;;  %v1626_v13 = vsel %vm1618_vm5, %v1617_v26, %v2045_v14  ;;  %v1661_v14 = vld [vmem:[#allocation2 + $0x38] sm:$0xff] }
 0x186   : > { %v2038_v1 = vpop.permute.xlu1 %2037 }
 0x187   : > { %v2040_v8 = vunpack.i.h.bf16 %v2038_v1  ;;  %v2039_v42 = vunpack.i.l.bf16 %v2038_v1 }
 0x188   : > { %v2058_v27 = vpop.permute.xlu2 %2057 }
 0x189   : > { %v2060_v5 = vunpack.i.h.bf16 %v2058_v27  ;;  %v2059_v61 = vunpack.i.l.bf16 %v2058_v27  ;;  %v1628_v50 = vsel %vm1627_vm6, %v1619_v58, %v2039_v42  ;;  %v1630_v62 = vsel %vm1627_vm6, %v1621_v51, %v2040_v8 }
 0x18a   : > { %v2048_v23 = vpop.permute.xlu0 %2047 }
 0x18b   : > { %v2050_v25 = vunpack.i.h.bf16 %v2048_v23  ;;  %v2049_v22 = vunpack.i.l.bf16 %v2048_v23 }
 0x18d   : > { %v1637_v54 = vsel %vm1636_vm7, %v1628_v50, %v2049_v22  ;;  %v1639_v56 = vsel %vm1636_vm7, %v1630_v62, %v2050_v25 }
 0x18e   : > { %v1646_v11 = vsel %vm1645_vm8, %v1637_v54, %v2059_v61  ;;  %v1648_v52 = vsel %vm1645_vm8, %v1639_v56, %v2060_v5 }
 0x18f   : > { %1678 = vmatmul.f32.vlgmr.msra.gmra.mxu0 %v1646_v11  ;;  %1684 = vmatmul.f32.vlgmr.msra.gmra.mxu1 %v1648_v52 }
 0x190   : > { %v2073_v10 = vpop.permute.xlu2 %2072 }
 0x191   : > { %v2075_v3 = vunpack.i.h.bf16 %v2073_v10  ;;  %v2074_v24 = vunpack.i.l.bf16 %v2073_v10 }
 0x196   : > { %v2053_v45 = vpop.permute.xlu1 %2052 }
 0x197   : > { %v2055_v30 = vunpack.i.h.bf16 %v2053_v45  ;;  %v2054_v53 = vunpack.i.l.bf16 %v2053_v45 }
 0x199   : > { %v1633_v41 = vsel %vm1627_vm6, %v1624_v40, %v2054_v53  ;;  %v1635_v32 = vsel %vm1627_vm6, %v1626_v13, %v2055_v30  ;;  %v1659_v53 = vld [vmem:[#allocation2 + $0x28] sm:$0xff]  ;;  %v1657_v40 = vld [vmem:[#allocation2 + $0x18] sm:$0xff] }
 0x19a   : > { %v2063_v31 = vpop.permute.xlu0 %2062 }
 0x19b   : > { %v2065_v44 = vunpack.i.h.bf16 %v2063_v31  ;;  %v2064_v39 = vunpack.i.l.bf16 %v2063_v31 }
 0x19d   : > { %v1642_v0 = vsel %vm1636_vm7, %v1633_v41, %v2064_v39  ;;  %v1644_v9 = vsel %vm1636_vm7, %v1635_v32, %v2065_v44  ;;  %v1655_v39 = vld [vmem:[#allocation2 + $0x8] sm:$0xff] }
 0x19e   : > { %v1651_v18 = vsel %vm1645_vm8, %v1642_v0, %v2074_v24  ;;  %v1653_v19 = vsel %vm1645_vm8, %v1644_v9, %v2075_v3 }
 0x19f   : > { %1693 = vmatmul.f32.gmra.mxu2 %v1651_v18  ;;  %1699 = vmatmul.f32.gmra.mxu3 %v1653_v19 }
 0x1a1   : > { %v2088_v1 = vpop.permute.xlu2 %2087 }
 0x1a2   : > { %v2090_v58 = vunpack.i.h.bf16 %v2088_v1  ;;  %v2089_v51 = vunpack.i.l.bf16 %v2088_v1 }
 0x1a5   : > { %v2068_v55 = vpop.permute.xlu1 %2067 }
 0x1a6   : > { %v2070_v29 = vunpack.i.h.bf16 %v2068_v55  ;;  %v2069_v46 = vunpack.i.l.bf16 %v2068_v55 }
 0x1a8   : > { %v1595_v33 = vsel %vm1591_vm2, %v3128_v34, %v2070_v29  ;;  %v1593_v8 = vsel %vm1591_vm2, %v3122_v28, %v2069_v46 }
 0x1a9   : > { %v2103_v50 = vpop.permute.xlu2 %2102 }
 0x1aa   : > { %v2105_v6 = vunpack.i.h.bf16 %v2103_v50  ;;  %v2104_v49 = vunpack.i.l.bf16 %v2103_v50 }
 0x1ab   : > { %v2078_v2 = vpop.permute.xlu0 %2077 }
 0x1ac   : > { %v2080_v12 = vunpack.i.h.bf16 %v2078_v2  ;;  %v2079_v21 = vunpack.i.l.bf16 %v2078_v2 }
 0x1ad   : > { %v2083_v15 = vpop.permute.xlu1 %2082 }
 0x1ae   : > { %v2085_v42 = vunpack.i.h.bf16 %v2083_v15  ;;  %v2084_v47 = vunpack.i.l.bf16 %v2083_v15  ;;  %v1602_v20 = vsel %vm1600_vm3, %v1593_v8, %v2079_v21  ;;  %v1604_v27 = vsel %vm1600_vm3, %v1595_v33, %v2080_v12 }
 0x1b0   : > { %v1611_v23 = vsel %vm1609_vm4, %v1602_v20, %v2084_v47  ;;  %v1613_v25 = vsel %vm1609_vm4, %v1604_v27, %v2085_v42 }
 0x1b1   : > { %v1620_v34 = vsel %vm1618_vm5, %v1611_v23, %v2089_v51  ;;  %v1622_v28 = vsel %vm1618_vm5, %v1613_v25, %v2090_v58 }
 0x1b8   : > { %v2093_v22 = vpop.permute.xlu0 %2092 }
 0x1b9   : > { %v2095_v5 = vunpack.i.h.bf16 %v2093_v22  ;;  %v2094_v61 = vunpack.i.l.bf16 %v2093_v22 }
 0x1bb   : > { %v2098_v62 = vpop.permute.xlu1 %2097  ;;  %v1629_v54 = vsel %vm1627_vm6, %v1620_v34, %v2094_v61  ;;  %v1631_v56 = vsel %vm1627_vm6, %v1622_v28, %v2095_v5 }
 0x1bc   : > { %v2100_v11 = vunpack.i.h.bf16 %v2098_v62  ;;  %v2099_v52 = vunpack.i.l.bf16 %v2098_v62 }
 0x1be   : > { %v1638_v60 = vsel %vm1636_vm7, %v1629_v54, %v2099_v52  ;;  %v1640_v16 = vsel %vm1636_vm7, %v1631_v56, %v2100_v11 }
 0x1bf   : > { %v1647_v35 = vsel %vm1645_vm8, %v1638_v60, %v2104_v49  ;;  %v1649_v48 = vsel %vm1645_vm8, %v1640_v16, %v2105_v6 }
 0x1c0   : > { %1681 = vmatmul.f32.gmra.mxu0 %v1647_v35  ;;  %1687 = vmatmul.f32.gmra.mxu1 %v1649_v48 }
 0x1e4   : > { %v1691_v36 = vpop.f32.mrf.mxu2  ;;  %v1697_v57 = vpop.f32.mrf.mxu3 }
 0x1e5   : > { %v1707_v45 = vadd.f32 %v1691_v36, %v1658_v38  ;;  %v1709_v37 = vadd.f32 %v1697_v57, %v1660_v17 }
 0x1e7   : > { %1716 = vst.msk [vmem:[#allocation2 + $0x20] sm:$0xff] %vm1711_vm9, %v1707_v45 }
 0x1e8   : > { %1718 = vst.msk [vmem:[#allocation2 + $0x30] sm:$0xff] %vm1711_vm9, %v1709_v37 }
 0x20c   : > { %v1679_v59 = vpop.f32.mrf.mxu0  ;;  %v1685_v43 = vpop.f32.mrf.mxu1 }
 0x20d   : > { %v1703_v26 = vadd.f32 %v1679_v59, %v1654_v63  ;;  %v1705_v30 = vadd.f32 %v1685_v43, %v1656_v4 }
 0x20f   : > { %1712 = vst.msk [vmem:[#allocation2] sm:$0xff] %vm1711_vm9, %v1703_v26 }
 0x210   : > { %1714 = vst.msk [vmem:[#allocation2 + $0x10] sm:$0xff] %vm1711_vm9, %v1705_v30 }
 0x222   : > { %v1694_v7 = vpop.f32.mrf.mxu2  ;;  %v1700_v10 = vpop.f32.mrf.mxu3 }
 0x223   : > { %v1708_v31 = vadd.f32 %v1694_v7, %v1659_v53  ;;  %v1710_v44 = vadd.f32 %v1700_v10, %v1661_v14 }
 0x225   : > { %1717 = vst.msk [vmem:[#allocation2 + $0x28] sm:$0xff] %vm1711_vm9, %v1708_v31 }
 0x226   : > { %1719 = vst.msk [vmem:[#allocation2 + $0x38] sm:$0xff] %vm1711_vm9, %v1710_v44 }
 0x23d   : > { %v1682_v13 = vpop.f32.mrf.mxu0  ;;  %v1688_v3 = vpop.f32.mrf.mxu1  ;;  %1723 = sbr.rel (%p1859_p10) target bundleno = 587 (0x24b), region = 40 }
 0x23e   : > { %v1704_v24 = vadd.f32 %v1682_v13, %v1655_v39  ;;  %v1706_v41 = vadd.f32 %v1688_v3, %v1657_v40 }
 0x240   : > { %1713 = vst.msk [vmem:[#allocation2 + $0x8] sm:$0xff] %vm1711_vm9, %v1704_v24 }
 0x241   : > { %1715 = vst.msk [vmem:[#allocation2 + $0x18] sm:$0xff] %vm1711_vm9, %v1706_v41 }
 0x242   : > { %v1724_v32 = vld [vmem:[#allocation2] sm:$0xff]  ;;  %v1726_v9 = vld [vmem:[#allocation2 + $0x10] sm:$0xff]  ;;  %v1729_v55 = vld [vmem:[#allocation2 + $0x28] sm:$0xff] }
 0x243   : > { %1732 = vst.msk [vmem:[%s2261_s18] sm:$0xff] %vm1711_vm9, %v1724_v32  ;;  %v1728_v19 = vld [vmem:[#allocation2 + $0x20] sm:$0xff]  ;;  %v1730_v2 = vld [vmem:[#allocation2 + $0x30] sm:$0xff]  ;;  %v1731_v29 = vld [vmem:[#allocation2 + $0x38] sm:$0xff] }
 0x244   : > { %1734 = vst.msk [vmem:[%s2261_s18 + $0x10] sm:$0xff] %vm1711_vm9, %v1726_v9 }
 0x245   : > { %1736 = vst.msk [vmem:[%s2261_s18 + $0x20] sm:$0xff] %vm1711_vm9, %v1728_v19 }
 0x246   : > { %1737 = vst.msk [vmem:[%s2261_s18 + $0x28] sm:$0xff] %vm1711_vm9, %v1729_v55 }
 0x247   : > { %v1725_v0 = vld [vmem:[#allocation2 + $0x8] sm:$0xff]  ;;  %1738 = vst.msk [vmem:[%s2261_s18 + $0x30] sm:$0xff] %vm1711_vm9, %v1730_v2 }
 0x248   : > { %v1727_v18 = vld [vmem:[#allocation2 + $0x18] sm:$0xff]  ;;  %1733 = vst.msk [vmem:[%s2261_s18 + $0x8] sm:$0xff] %vm1711_vm9, %v1725_v0 }
 0x249   : > { %1735 = vst.msk [vmem:[%s2261_s18 + $0x18] sm:$0xff] %vm1711_vm9, %v1727_v18 }
 0x24a   : > { %1739 = vst.msk [vmem:[%s2261_s18 + $0x38] sm:$0xff] %vm1711_vm9, %v1731_v29 }
 0x24b PF: > { %s28_s29 = sadd.s32 1, %s2170_s29   ;;  %s3431_s26 = smov %s2162_s28 }
 0x24c   : > { %p25_p11 = scmp.ge.s32.totalorder %s28_s29, 12   ;;  %s3432_s27 = smov %s2166_s0 }
 0x24d   : > { %s3433_s28 = smov %s3436_s1  ;;  %s3434_s0 = smov %s3440_s30 }
 0x24e   :  { %27 = sbr.rel (!%p25_p11) target bundleno = 10 (0xa), region = 76 }

</bundles_post_ra>
